<compile_context>
chip_gen: v7x
topology: tpu7x:2x2x1
jax: 0.10.0
libtpu: 0.0.40
codegen_flags: <defaults>
</compile_context>

<pallas_src>
import functools

import jax
import jax.numpy as jnp
from jax.experimental import pallas as pl
from jax.experimental.pallas import tpu as pltpu


def _fused_lstm_kernel(x_ref, *refs, num_layers, hidden, seq_len, batch_padded):
    """Fused stacked-LSTM forward, everything register/VMEM resident.

    refs layout:
      refs[3*l + 0] : W_ih^T for layer l, shape (in_l, 4H)
      refs[3*l + 1] : W_hh^T for layer l, shape (H, 4H)
      refs[3*l + 2] : bias   for layer l, shape (1, 4H)   (= b_ih + b_hh)
      refs[3*L]     : y_ref, shape (Bp, T*H)  -- lane-dense final output
    Row t*Bp + b of the (T*Bp, ...) input corresponds to (time t, batch b).
    """
    H = hidden
    T = seq_len
    Bp = batch_padded
    L = num_layers
    y_ref = refs[3 * L]

    src = x_ref[...]                                           # (T*Bp, in_0), loaded once

    for layer in range(L):                                     # static unroll over layers
        wih = refs[3 * layer][...]                             # (in_l, 4H)
        whh = refs[3 * layer + 1][...]                         # (H, 4H), loop-invariant
        b = refs[3 * layer + 2][...]                           # (1, 4H)

        # ---- bulk input projection for ALL timesteps (off the serial path) ----
        xproj = jnp.dot(src, wih, preferred_element_type=jnp.float32) + b   # (T*Bp, 4H)

        h = jnp.zeros((Bp, H), jnp.float32)                    # stateless: h0 = c0 = 0
        c = jnp.zeros((Bp, H), jnp.float32)
        hs = []
        for t in range(T):                                     # static unroll; h/c/hs in vregs
            xp = xproj[t * Bp:(t + 1) * Bp, :]                 # aligned (8, 4H) tile, static slice
            gates = xp + jnp.dot(h, whh, preferred_element_type=jnp.float32)
            # single-EUP sigmoid: sigmoid(x) = 0.5 * (tanh(0.5*x) + 1)
            sig = 0.5 * (jnp.tanh(0.5 * gates) + 1.0)
            i_g = sig[:, 0 * H:1 * H]
            f_g = sig[:, 1 * H:2 * H]
            g_g = jnp.tanh(gates[:, 2 * H:3 * H])
            o_g = sig[:, 3 * H:4 * H]
            c = f_g * c + i_g * g_g
            h = o_g * jnp.tanh(c)
            hs.append(h)

        if layer == L - 1:
            # Lane-dense output: one bulk (Bp, T*H) store, off the serial path.
            y_ref[...] = jnp.concatenate(hs, axis=1)
        else:
            # Inter-layer activations stay in registers; feed next layer's bulk matmul.
            src = jnp.concatenate(hs, axis=0)                  # (T*Bp, H)


def stateless_lstm_forward(x_btf, params):
    """Full StatelessLSTM forward: x (B, T, F) -> (B, T, H), one fused pallas_call."""
    B, T, F_in = x_btf.shape
    H = params[0][1].shape[1]                 # w_hh: (4H, H)
    L = len(params)
    Bp = ((B + 7) // 8) * 8                   # pad batch to the 8-sublane tile
    Bp = max(Bp, 8)

    # Time-major, batch padded with zeros; row t*Bp + b  <->  x[b, t, :].
    x_tbf = jnp.transpose(x_btf, (1, 0, 2)).astype(jnp.float32)      # (T, B, F)
    x_tbf = jnp.pad(x_tbf, ((0, 0), (0, Bp - B), (0, 0)))            # (T, Bp, F)
    x_2d = x_tbf.reshape(T * Bp, F_in)

    inputs = [x_2d]
    for (w_ih, w_hh, b_ih, b_hh) in params:
        inputs.append(jnp.transpose(w_ih).astype(jnp.float32))               # (in_l, 4H)
        inputs.append(jnp.transpose(w_hh).astype(jnp.float32))               # (H, 4H)
        inputs.append((b_ih + b_hh).reshape(1, 4 * H).astype(jnp.float32))   # (1, 4H)

    vmem_spec = pl.BlockSpec(memory_space=pltpu.MemorySpace.VMEM)    # whole array, no pipelining

    kernel = functools.partial(
        _fused_lstm_kernel, num_layers=L, hidden=H, seq_len=T, batch_padded=Bp)

    out = pl.pallas_call(
        kernel,
        out_shape=jax.ShapeDtypeStruct((Bp, T * H), jnp.float32),    # lane-dense output slab
        in_specs=[vmem_spec] * len(inputs),
        out_specs=vmem_spec,
    )(*inputs)

    # Drop padded batch rows; out[b, t*H + h] == h_t[b, h]  ->  (B, T, H), batch_first.
    return out[:B].reshape(B, T, H)


def init_lstm_params(key, num_features, hidden, num_layers):
    """Deterministic params matching nn.LSTM shapes, U(-1/sqrt(H), 1/sqrt(H))."""
    params = []
    bound = 1.0 / (hidden ** 0.5)
    for layer in range(num_layers):
        in_size = num_features if layer == 0 else hidden
        key, k1, k2, k3, k4 = jax.random.split(key, 5)
        w_ih = jax.random.uniform(k1, (4 * hidden, in_size), jnp.float32, -bound, bound)
        w_hh = jax.random.uniform(k2, (4 * hidden, hidden), jnp.float32, -bound, bound)
        b_ih = jax.random.uniform(k3, (4 * hidden,), jnp.float32, -bound, bound)
        b_hh = jax.random.uniform(k4, (4 * hidden,), jnp.float32, -bound, bound)
        params.append((w_ih, w_hh, b_ih, b_hh))
    return params


def _reference_forward(x_btf, params):
    """Pure-JAX reference (lax.scan) of the same stacked LSTM, for validation."""
    def layer(x_tbf, w_ih, w_hh, b_ih, b_hh):
        H = w_hh.shape[1]
        B = x_tbf.shape[1]
        bias = b_ih + b_hh

        def step(carry, x_t):
            h, c = carry
            gates = x_t @ w_ih.T + h @ w_hh.T + bias
            i = jax.nn.sigmoid(gates[:, 0 * H:1 * H])
            f = jax.nn.sigmoid(gates[:, 1 * H:2 * H])
            g = jnp.tanh(gates[:, 2 * H:3 * H])
            o = jax.nn.sigmoid(gates[:, 3 * H:4 * H])
            c_new = f * c + i * g
            h_new = o * jnp.tanh(c_new)
            return (h_new, c_new), h_new

        init = (jnp.zeros((B, H), jnp.float32), jnp.zeros((B, H), jnp.float32))
        _, ys = jax.lax.scan(step, init, x_tbf)
        return ys

    x = jnp.transpose(x_btf, (1, 0, 2))
    for (w_ih, w_hh, b_ih, b_hh) in params:
        x = layer(x, w_ih, w_hh, b_ih, b_hh)
    return jnp.transpose(x, (1, 0, 2))


if __name__ == "__main__":
    # Shapes implied by the module: num_features=4, hidden=32, num_stacked_LSTMs=2.
    B, T, F = 2, 8, 4
    H, L = 32, 2

    key = jax.random.PRNGKey(0)
    key, kx = jax.random.split(key)
    x = jax.random.normal(kx, (B, T, F), jnp.float32)

    params = init_lstm_params(key, F, H, L)

    out = stateless_lstm_forward(x, params)
    out = jax.block_until_ready(out)
    assert out.shape == (B, T, H), out.shape

    ref = jax.block_until_ready(_reference_forward(x, params))
    assert jnp.allclose(out, ref, atol=1e-4, rtol=1e-4), float(jnp.max(jnp.abs(out - ref)))

    print("KERNEL_OK")
</pallas_src>

<mosaic_0001>
module attributes {stable_mosaic.version = 11 : i64} {
  func.func @_fused_lstm_kernel(%arg0: memref<64x4xf32, #tpu.memory_space<vmem>>, %arg1: memref<4x128xf32, #tpu.memory_space<vmem>>, %arg2: memref<32x128xf32, #tpu.memory_space<vmem>>, %arg3: memref<1x128xf32, #tpu.memory_space<vmem>>, %arg4: memref<32x128xf32, #tpu.memory_space<vmem>>, %arg5: memref<32x128xf32, #tpu.memory_space<vmem>>, %arg6: memref<1x128xf32, #tpu.memory_space<vmem>>, %arg7: memref<8x256xf32, #tpu.memory_space<vmem>>) attributes {dimension_semantics = [], scalar_prefetch = 0 : i64, scratch_operands = 0 : i64, tpu.core_type = #tpu.core_type<tc>} {
    %c0 = arith.constant 0 : index
    %c0_0 = arith.constant 0 : index
    %0 = vector.load %arg0[%c0, %c0_0] : memref<64x4xf32, #tpu.memory_space<vmem>>, vector<64x4xf32>
    %c0_1 = arith.constant 0 : index
    %c0_2 = arith.constant 0 : index
    %1 = vector.load %arg1[%c0_1, %c0_2] : memref<4x128xf32, #tpu.memory_space<vmem>>, vector<4x128xf32>
    %c0_3 = arith.constant 0 : index
    %c0_4 = arith.constant 0 : index
    %2 = vector.load %arg2[%c0_3, %c0_4] : memref<32x128xf32, #tpu.memory_space<vmem>>, vector<32x128xf32>
    %c0_5 = arith.constant 0 : index
    %c0_6 = arith.constant 0 : index
    %3 = vector.load %arg3[%c0_5, %c0_6] : memref<1x128xf32, #tpu.memory_space<vmem>>, vector<1x128xf32>
    %cst = arith.constant dense<0.000000e+00> : vector<64x128xf32>
    %4 = tpu.matmul %0, %1, %cst {dimension_numbers = #tpu.dot_dimension_numbers<[1], [0], [0], [1], [0, 0, 1, 1], [], []>} : vector<64x4xf32>, vector<4x128xf32>, vector<64x128xf32> -> vector<64x128xf32>
    %5 = vector.broadcast %3 : vector<1x128xf32> to vector<64x128xf32>
    %6 = arith.addf %4, %5 : vector<64x128xf32>
    %cst_7 = arith.constant 0.000000e+00 : f32
    %7 = vector.broadcast %cst_7 : f32 to vector<8x32xf32>
    %cst_8 = arith.constant 0.000000e+00 : f32
    %8 = vector.broadcast %cst_8 : f32 to vector<8x32xf32>
    %9 = vector.extract_strided_slice %6 {offsets = [0, 0], sizes = [8, 128], strides = [1, 1]} : vector<64x128xf32> to vector<8x128xf32>
    %cst_9 = arith.constant dense<0.000000e+00> : vector<8x128xf32>
    %10 = tpu.matmul %7, %2, %cst_9 {dimension_numbers = #tpu.dot_dimension_numbers<[1], [0], [0], [1], [0, 0, 1, 1], [], []>} : vector<8x32xf32>, vector<32x128xf32>, vector<8x128xf32> -> vector<8x128xf32>
    %11 = arith.addf %9, %10 : vector<8x128xf32>
    %cst_10 = arith.constant 5.000000e-01 : f32
    %12 = vector.broadcast %cst_10 : f32 to vector<8x128xf32>
    %13 = arith.mulf %12, %11 : vector<8x128xf32>
    %14 = math.tanh %13 : vector<8x128xf32>
    %cst_11 = arith.constant 1.000000e+00 : f32
    %15 = vector.broadcast %cst_11 : f32 to vector<8x128xf32>
    %16 = arith.addf %14, %15 : vector<8x128xf32>
    %cst_12 = arith.constant 5.000000e-01 : f32
    %17 = vector.broadcast %cst_12 : f32 to vector<8x128xf32>
    %18 = arith.mulf %17, %16 : vector<8x128xf32>
    %19 = vector.extract_strided_slice %18 {offsets = [0, 0], sizes = [8, 32], strides = [1, 1]} : vector<8x128xf32> to vector<8x32xf32>
    %20 = vector.extract_strided_slice %18 {offsets = [0, 32], sizes = [8, 32], strides = [1, 1]} : vector<8x128xf32> to vector<8x32xf32>
    %21 = vector.extract_strided_slice %11 {offsets = [0, 64], sizes = [8, 32], strides = [1, 1]} : vector<8x128xf32> to vector<8x32xf32>
    %22 = math.tanh %21 : vector<8x32xf32>
    %23 = vector.extract_strided_slice %18 {offsets = [0, 96], sizes = [8, 32], strides = [1, 1]} : vector<8x128xf32> to vector<8x32xf32>
    %24 = arith.mulf %20, %8 : vector<8x32xf32>
    %25 = arith.mulf %19, %22 : vector<8x32xf32>
    %26 = arith.addf %24, %25 : vector<8x32xf32>
    %27 = math.tanh %26 : vector<8x32xf32>
    %28 = arith.mulf %23, %27 : vector<8x32xf32>
    %29 = vector.extract_strided_slice %6 {offsets = [8, 0], sizes = [8, 128], strides = [1, 1]} : vector<64x128xf32> to vector<8x128xf32>
    %cst_13 = arith.constant dense<0.000000e+00> : vector<8x128xf32>
    %30 = tpu.matmul %28, %2, %cst_13 {dimension_numbers = #tpu.dot_dimension_numbers<[1], [0], [0], [1], [0, 0, 1, 1], [], []>} : vector<8x32xf32>, vector<32x128xf32>, vector<8x128xf32> -> vector<8x128xf32>
    %31 = arith.addf %29, %30 : vector<8x128xf32>
    %cst_14 = arith.constant 5.000000e-01 : f32
    %32 = vector.broadcast %cst_14 : f32 to vector<8x128xf32>
    %33 = arith.mulf %32, %31 : vector<8x128xf32>
    %34 = math.tanh %33 : vector<8x128xf32>
    %cst_15 = arith.constant 1.000000e+00 : f32
    %35 = vector.broadcast %cst_15 : f32 to vector<8x128xf32>
    %36 = arith.addf %34, %35 : vector<8x128xf32>
    %cst_16 = arith.constant 5.000000e-01 : f32
    %37 = vector.broadcast %cst_16 : f32 to vector<8x128xf32>
    %38 = arith.mulf %37, %36 : vector<8x128xf32>
    %39 = vector.extract_strided_slice %38 {offsets = [0, 0], sizes = [8, 32], strides = [1, 1]} : vector<8x128xf32> to vector<8x32xf32>
    %40 = vector.extract_strided_slice %38 {offsets = [0, 32], sizes = [8, 32], strides = [1, 1]} : vector<8x128xf32> to vector<8x32xf32>
    %41 = vector.extract_strided_slice %31 {offsets = [0, 64], sizes = [8, 32], strides = [1, 1]} : vector<8x128xf32> to vector<8x32xf32>
    %42 = math.tanh %41 : vector<8x32xf32>
    %43 = vector.extract_strided_slice %38 {offsets = [0, 96], sizes = [8, 32], strides = [1, 1]} : vector<8x128xf32> to vector<8x32xf32>
    %44 = arith.mulf %40, %26 : vector<8x32xf32>
    %45 = arith.mulf %39, %42 : vector<8x32xf32>
    %46 = arith.addf %44, %45 : vector<8x32xf32>
    %47 = math.tanh %46 : vector<8x32xf32>
    %48 = arith.mulf %43, %47 : vector<8x32xf32>
    %49 = vector.extract_strided_slice %6 {offsets = [16, 0], sizes = [8, 128], strides = [1, 1]} : vector<64x128xf32> to vector<8x128xf32>
    %cst_17 = arith.constant dense<0.000000e+00> : vector<8x128xf32>
    %50 = tpu.matmul %48, %2, %cst_17 {dimension_numbers = #tpu.dot_dimension_numbers<[1], [0], [0], [1], [0, 0, 1, 1], [], []>} : vector<8x32xf32>, vector<32x128xf32>, vector<8x128xf32> -> vector<8x128xf32>
    %51 = arith.addf %49, %50 : vector<8x128xf32>
    %cst_18 = arith.constant 5.000000e-01 : f32
    %52 = vector.broadcast %cst_18 : f32 to vector<8x128xf32>
    %53 = arith.mulf %52, %51 : vector<8x128xf32>
    %54 = math.tanh %53 : vector<8x128xf32>
    %cst_19 = arith.constant 1.000000e+00 : f32
    %55 = vector.broadcast %cst_19 : f32 to vector<8x128xf32>
    %56 = arith.addf %54, %55 : vector<8x128xf32>
    %cst_20 = arith.constant 5.000000e-01 : f32
    %57 = vector.broadcast %cst_20 : f32 to vector<8x128xf32>
    %58 = arith.mulf %57, %56 : vector<8x128xf32>
    %59 = vector.extract_strided_slice %58 {offsets = [0, 0], sizes = [8, 32], strides = [1, 1]} : vector<8x128xf32> to vector<8x32xf32>
    %60 = vector.extract_strided_slice %58 {offsets = [0, 32], sizes = [8, 32], strides = [1, 1]} : vector<8x128xf32> to vector<8x32xf32>
    %61 = vector.extract_strided_slice %51 {offsets = [0, 64], sizes = [8, 32], strides = [1, 1]} : vector<8x128xf32> to vector<8x32xf32>
    %62 = math.tanh %61 : vector<8x32xf32>
    %63 = vector.extract_strided_slice %58 {offsets = [0, 96], sizes = [8, 32], strides = [1, 1]} : vector<8x128xf32> to vector<8x32xf32>
    %64 = arith.mulf %60, %46 : vector<8x32xf32>
    %65 = arith.mulf %59, %62 : vector<8x32xf32>
    %66 = arith.addf %64, %65 : vector<8x32xf32>
    %67 = math.tanh %66 : vector<8x32xf32>
    %68 = arith.mulf %63, %67 : vector<8x32xf32>
    %69 = vector.extract_strided_slice %6 {offsets = [24, 0], sizes = [8, 128], strides = [1, 1]} : vector<64x128xf32> to vector<8x128xf32>
    %cst_21 = arith.constant dense<0.000000e+00> : vector<8x128xf32>
    %70 = tpu.matmul %68, %2, %cst_21 {dimension_numbers = #tpu.dot_dimension_numbers<[1], [0], [0], [1], [0, 0, 1, 1], [], []>} : vector<8x32xf32>, vector<32x128xf32>, vector<8x128xf32> -> vector<8x128xf32>
    %71 = arith.addf %69, %70 : vector<8x128xf32>
    %cst_22 = arith.constant 5.000000e-01 : f32
    %72 = vector.broadcast %cst_22 : f32 to vector<8x128xf32>
    %73 = arith.mulf %72, %71 : vector<8x128xf32>
    %74 = math.tanh %73 : vector<8x128xf32>
    %cst_23 = arith.constant 1.000000e+00 : f32
    %75 = vector.broadcast %cst_23 : f32 to vector<8x128xf32>
    %76 = arith.addf %74, %75 : vector<8x128xf32>
    %cst_24 = arith.constant 5.000000e-01 : f32
    %77 = vector.broadcast %cst_24 : f32 to vector<8x128xf32>
    %78 = arith.mulf %77, %76 : vector<8x128xf32>
    %79 = vector.extract_strided_slice %78 {offsets = [0, 0], sizes = [8, 32], strides = [1, 1]} : vector<8x128xf32> to vector<8x32xf32>
    %80 = vector.extract_strided_slice %78 {offsets = [0, 32], sizes = [8, 32], strides = [1, 1]} : vector<8x128xf32> to vector<8x32xf32>
    %81 = vector.extract_strided_slice %71 {offsets = [0, 64], sizes = [8, 32], strides = [1, 1]} : vector<8x128xf32> to vector<8x32xf32>
    %82 = math.tanh %81 : vector<8x32xf32>
    %83 = vector.extract_strided_slice %78 {offsets = [0, 96], sizes = [8, 32], strides = [1, 1]} : vector<8x128xf32> to vector<8x32xf32>
    %84 = arith.mulf %80, %66 : vector<8x32xf32>
    %85 = arith.mulf %79, %82 : vector<8x32xf32>
    %86 = arith.addf %84, %85 : vector<8x32xf32>
    %87 = math.tanh %86 : vector<8x32xf32>
    %88 = arith.mulf %83, %87 : vector<8x32xf32>
    %89 = vector.extract_strided_slice %6 {offsets = [32, 0], sizes = [8, 128], strides = [1, 1]} : vector<64x128xf32> to vector<8x128xf32>
    %cst_25 = arith.constant dense<0.000000e+00> : vector<8x128xf32>
    %90 = tpu.matmul %88, %2, %cst_25 {dimension_numbers = #tpu.dot_dimension_numbers<[1], [0], [0], [1], [0, 0, 1, 1], [], []>} : vector<8x32xf32>, vector<32x128xf32>, vector<8x128xf32> -> vector<8x128xf32>
    %91 = arith.addf %89, %90 : vector<8x128xf32>
    %cst_26 = arith.constant 5.000000e-01 : f32
    %92 = vector.broadcast %cst_26 : f32 to vector<8x128xf32>
    %93 = arith.mulf %92, %91 : vector<8x128xf32>
    %94 = math.tanh %93 : vector<8x128xf32>
    %cst_27 = arith.constant 1.000000e+00 : f32
    %95 = vector.broadcast %cst_27 : f32 to vector<8x128xf32>
    %96 = arith.addf %94, %95 : vector<8x128xf32>
    %cst_28 = arith.constant 5.000000e-01 : f32
    %97 = vector.broadcast %cst_28 : f32 to vector<8x128xf32>
    %98 = arith.mulf %97, %96 : vector<8x128xf32>
    %99 = vector.extract_strided_slice %98 {offsets = [0, 0], sizes = [8, 32], strides = [1, 1]} : vector<8x128xf32> to vector<8x32xf32>
    %100 = vector.extract_strided_slice %98 {offsets = [0, 32], sizes = [8, 32], strides = [1, 1]} : vector<8x128xf32> to vector<8x32xf32>
    %101 = vector.extract_strided_slice %91 {offsets = [0, 64], sizes = [8, 32], strides = [1, 1]} : vector<8x128xf32> to vector<8x32xf32>
    %102 = math.tanh %101 : vector<8x32xf32>
    %103 = vector.extract_strided_slice %98 {offsets = [0, 96], sizes = [8, 32], strides = [1, 1]} : vector<8x128xf32> to vector<8x32xf32>
    %104 = arith.mulf %100, %86 : vector<8x32xf32>
    %105 = arith.mulf %99, %102 : vector<8x32xf32>
    %106 = arith.addf %104, %105 : vector<8x32xf32>
    %107 = math.tanh %106 : vector<8x32xf32>
    %108 = arith.mulf %103, %107 : vector<8x32xf32>
    %109 = vector.extract_strided_slice %6 {offsets = [40, 0], sizes = [8, 128], strides = [1, 1]} : vector<64x128xf32> to vector<8x128xf32>
    %cst_29 = arith.constant dense<0.000000e+00> : vector<8x128xf32>
    %110 = tpu.matmul %108, %2, %cst_29 {dimension_numbers = #tpu.dot_dimension_numbers<[1], [0], [0], [1], [0, 0, 1, 1], [], []>} : vector<8x32xf32>, vector<32x128xf32>, vector<8x128xf32> -> vector<8x128xf32>
    %111 = arith.addf %109, %110 : vector<8x128xf32>
    %cst_30 = arith.constant 5.000000e-01 : f32
    %112 = vector.broadcast %cst_30 : f32 to vector<8x128xf32>
    %113 = arith.mulf %112, %111 : vector<8x128xf32>
    %114 = math.tanh %113 : vector<8x128xf32>
    %cst_31 = arith.constant 1.000000e+00 : f32
    %115 = vector.broadcast %cst_31 : f32 to vector<8x128xf32>
    %116 = arith.addf %114, %115 : vector<8x128xf32>
    %cst_32 = arith.constant 5.000000e-01 : f32
    %117 = vector.broadcast %cst_32 : f32 to vector<8x128xf32>
    %118 = arith.mulf %117, %116 : vector<8x128xf32>
    %119 = vector.extract_strided_slice %118 {offsets = [0, 0], sizes = [8, 32], strides = [1, 1]} : vector<8x128xf32> to vector<8x32xf32>
    %120 = vector.extract_strided_slice %118 {offsets = [0, 32], sizes = [8, 32], strides = [1, 1]} : vector<8x128xf32> to vector<8x32xf32>
    %121 = vector.extract_strided_slice %111 {offsets = [0, 64], sizes = [8, 32], strides = [1, 1]} : vector<8x128xf32> to vector<8x32xf32>
    %122 = math.tanh %121 : vector<8x32xf32>
    %123 = vector.extract_strided_slice %118 {offsets = [0, 96], sizes = [8, 32], strides = [1, 1]} : vector<8x128xf32> to vector<8x32xf32>
    %124 = arith.mulf %120, %106 : vector<8x32xf32>
    %125 = arith.mulf %119, %122 : vector<8x32xf32>
    %126 = arith.addf %124, %125 : vector<8x32xf32>
    %127 = math.tanh %126 : vector<8x32xf32>
    %128 = arith.mulf %123, %127 : vector<8x32xf32>
    %129 = vector.extract_strided_slice %6 {offsets = [48, 0], sizes = [8, 128], strides = [1, 1]} : vector<64x128xf32> to vector<8x128xf32>
    %cst_33 = arith.constant dense<0.000000e+00> : vector<8x128xf32>
    %130 = tpu.matmul %128, %2, %cst_33 {dimension_numbers = #tpu.dot_dimension_numbers<[1], [0], [0], [1], [0, 0, 1, 1], [], []>} : vector<8x32xf32>, vector<32x128xf32>, vector<8x128xf32> -> vector<8x128xf32>
    %131 = arith.addf %129, %130 : vector<8x128xf32>
    %cst_34 = arith.constant 5.000000e-01 : f32
    %132 = vector.broadcast %cst_34 : f32 to vector<8x128xf32>
    %133 = arith.mulf %132, %131 : vector<8x128xf32>
    %134 = math.tanh %133 : vector<8x128xf32>
    %cst_35 = arith.constant 1.000000e+00 : f32
    %135 = vector.broadcast %cst_35 : f32 to vector<8x128xf32>
    %136 = arith.addf %134, %135 : vector<8x128xf32>
    %cst_36 = arith.constant 5.000000e-01 : f32
    %137 = vector.broadcast %cst_36 : f32 to vector<8x128xf32>
    %138 = arith.mulf %137, %136 : vector<8x128xf32>
    %139 = vector.extract_strided_slice %138 {offsets = [0, 0], sizes = [8, 32], strides = [1, 1]} : vector<8x128xf32> to vector<8x32xf32>
    %140 = vector.extract_strided_slice %138 {offsets = [0, 32], sizes = [8, 32], strides = [1, 1]} : vector<8x128xf32> to vector<8x32xf32>
    %141 = vector.extract_strided_slice %131 {offsets = [0, 64], sizes = [8, 32], strides = [1, 1]} : vector<8x128xf32> to vector<8x32xf32>
    %142 = math.tanh %141 : vector<8x32xf32>
    %143 = vector.extract_strided_slice %138 {offsets = [0, 96], sizes = [8, 32], strides = [1, 1]} : vector<8x128xf32> to vector<8x32xf32>
    %144 = arith.mulf %140, %126 : vector<8x32xf32>
    %145 = arith.mulf %139, %142 : vector<8x32xf32>
    %146 = arith.addf %144, %145 : vector<8x32xf32>
    %147 = math.tanh %146 : vector<8x32xf32>
    %148 = arith.mulf %143, %147 : vector<8x32xf32>
    %149 = vector.extract_strided_slice %6 {offsets = [56, 0], sizes = [8, 128], strides = [1, 1]} : vector<64x128xf32> to vector<8x128xf32>
    %cst_37 = arith.constant dense<0.000000e+00> : vector<8x128xf32>
    %150 = tpu.matmul %148, %2, %cst_37 {dimension_numbers = #tpu.dot_dimension_numbers<[1], [0], [0], [1], [0, 0, 1, 1], [], []>} : vector<8x32xf32>, vector<32x128xf32>, vector<8x128xf32> -> vector<8x128xf32>
    %151 = arith.addf %149, %150 : vector<8x128xf32>
    %cst_38 = arith.constant 5.000000e-01 : f32
    %152 = vector.broadcast %cst_38 : f32 to vector<8x128xf32>
    %153 = arith.mulf %152, %151 : vector<8x128xf32>
    %154 = math.tanh %153 : vector<8x128xf32>
    %cst_39 = arith.constant 1.000000e+00 : f32
    %155 = vector.broadcast %cst_39 : f32 to vector<8x128xf32>
    %156 = arith.addf %154, %155 : vector<8x128xf32>
    %cst_40 = arith.constant 5.000000e-01 : f32
    %157 = vector.broadcast %cst_40 : f32 to vector<8x128xf32>
    %158 = arith.mulf %157, %156 : vector<8x128xf32>
    %159 = vector.extract_strided_slice %158 {offsets = [0, 0], sizes = [8, 32], strides = [1, 1]} : vector<8x128xf32> to vector<8x32xf32>
    %160 = vector.extract_strided_slice %158 {offsets = [0, 32], sizes = [8, 32], strides = [1, 1]} : vector<8x128xf32> to vector<8x32xf32>
    %161 = vector.extract_strided_slice %151 {offsets = [0, 64], sizes = [8, 32], strides = [1, 1]} : vector<8x128xf32> to vector<8x32xf32>
    %162 = math.tanh %161 : vector<8x32xf32>
    %163 = vector.extract_strided_slice %158 {offsets = [0, 96], sizes = [8, 32], strides = [1, 1]} : vector<8x128xf32> to vector<8x32xf32>
    %164 = arith.mulf %160, %146 : vector<8x32xf32>
    %165 = arith.mulf %159, %162 : vector<8x32xf32>
    %166 = arith.addf %164, %165 : vector<8x32xf32>
    %167 = math.tanh %166 : vector<8x32xf32>
    %168 = arith.mulf %163, %167 : vector<8x32xf32>
    %169 = tpu.concatenate %28, %48, %68, %88, %108, %128, %148, %168 in 0 : vector<8x32xf32>, vector<8x32xf32>, vector<8x32xf32>, vector<8x32xf32>, vector<8x32xf32>, vector<8x32xf32>, vector<8x32xf32>, vector<8x32xf32> -> vector<64x32xf32>
    %c0_41 = arith.constant 0 : index
    %c0_42 = arith.constant 0 : index
    %170 = vector.load %arg4[%c0_41, %c0_42] : memref<32x128xf32, #tpu.memory_space<vmem>>, vector<32x128xf32>
    %c0_43 = arith.constant 0 : index
    %c0_44 = arith.constant 0 : index
    %171 = vector.load %arg5[%c0_43, %c0_44] : memref<32x128xf32, #tpu.memory_space<vmem>>, vector<32x128xf32>
    %c0_45 = arith.constant 0 : index
    %c0_46 = arith.constant 0 : index
    %172 = vector.load %arg6[%c0_45, %c0_46] : memref<1x128xf32, #tpu.memory_space<vmem>>, vector<1x128xf32>
    %cst_47 = arith.constant dense<0.000000e+00> : vector<64x128xf32>
    %173 = tpu.matmul %169, %170, %cst_47 {dimension_numbers = #tpu.dot_dimension_numbers<[1], [0], [0], [1], [0, 0, 1, 1], [], []>} : vector<64x32xf32>, vector<32x128xf32>, vector<64x128xf32> -> vector<64x128xf32>
    %174 = vector.broadcast %172 : vector<1x128xf32> to vector<64x128xf32>
    %175 = arith.addf %173, %174 : vector<64x128xf32>
    %cst_48 = arith.constant 0.000000e+00 : f32
    %176 = vector.broadcast %cst_48 : f32 to vector<8x32xf32>
    %cst_49 = arith.constant 0.000000e+00 : f32
    %177 = vector.broadcast %cst_49 : f32 to vector<8x32xf32>
    %178 = vector.extract_strided_slice %175 {offsets = [0, 0], sizes = [8, 128], strides = [1, 1]} : vector<64x128xf32> to vector<8x128xf32>
    %cst_50 = arith.constant dense<0.000000e+00> : vector<8x128xf32>
    %179 = tpu.matmul %176, %171, %cst_50 {dimension_numbers = #tpu.dot_dimension_numbers<[1], [0], [0], [1], [0, 0, 1, 1], [], []>} : vector<8x32xf32>, vector<32x128xf32>, vector<8x128xf32> -> vector<8x128xf32>
    %180 = arith.addf %178, %179 : vector<8x128xf32>
    %cst_51 = arith.constant 5.000000e-01 : f32
    %181 = vector.broadcast %cst_51 : f32 to vector<8x128xf32>
    %182 = arith.mulf %181, %180 : vector<8x128xf32>
    %183 = math.tanh %182 : vector<8x128xf32>
    %cst_52 = arith.constant 1.000000e+00 : f32
    %184 = vector.broadcast %cst_52 : f32 to vector<8x128xf32>
    %185 = arith.addf %183, %184 : vector<8x128xf32>
    %cst_53 = arith.constant 5.000000e-01 : f32
    %186 = vector.broadcast %cst_53 : f32 to vector<8x128xf32>
    %187 = arith.mulf %186, %185 : vector<8x128xf32>
    %188 = vector.extract_strided_slice %187 {offsets = [0, 0], sizes = [8, 32], strides = [1, 1]} : vector<8x128xf32> to vector<8x32xf32>
    %189 = vector.extract_strided_slice %187 {offsets = [0, 32], sizes = [8, 32], strides = [1, 1]} : vector<8x128xf32> to vector<8x32xf32>
    %190 = vector.extract_strided_slice %180 {offsets = [0, 64], sizes = [8, 32], strides = [1, 1]} : vector<8x128xf32> to vector<8x32xf32>
    %191 = math.tanh %190 : vector<8x32xf32>
    %192 = vector.extract_strided_slice %187 {offsets = [0, 96], sizes = [8, 32], strides = [1, 1]} : vector<8x128xf32> to vector<8x32xf32>
    %193 = arith.mulf %189, %177 : vector<8x32xf32>
    %194 = arith.mulf %188, %191 : vector<8x32xf32>
    %195 = arith.addf %193, %194 : vector<8x32xf32>
    %196 = math.tanh %195 : vector<8x32xf32>
    %197 = arith.mulf %192, %196 : vector<8x32xf32>
    %198 = vector.extract_strided_slice %175 {offsets = [8, 0], sizes = [8, 128], strides = [1, 1]} : vector<64x128xf32> to vector<8x128xf32>
    %cst_54 = arith.constant dense<0.000000e+00> : vector<8x128xf32>
    %199 = tpu.matmul %197, %171, %cst_54 {dimension_numbers = #tpu.dot_dimension_numbers<[1], [0], [0], [1], [0, 0, 1, 1], [], []>} : vector<8x32xf32>, vector<32x128xf32>, vector<8x128xf32> -> vector<8x128xf32>
    %200 = arith.addf %198, %199 : vector<8x128xf32>
    %cst_55 = arith.constant 5.000000e-01 : f32
    %201 = vector.broadcast %cst_55 : f32 to vector<8x128xf32>
    %202 = arith.mulf %201, %200 : vector<8x128xf32>
    %203 = math.tanh %202 : vector<8x128xf32>
    %cst_56 = arith.constant 1.000000e+00 : f32
    %204 = vector.broadcast %cst_56 : f32 to vector<8x128xf32>
    %205 = arith.addf %203, %204 : vector<8x128xf32>
    %cst_57 = arith.constant 5.000000e-01 : f32
    %206 = vector.broadcast %cst_57 : f32 to vector<8x128xf32>
    %207 = arith.mulf %206, %205 : vector<8x128xf32>
    %208 = vector.extract_strided_slice %207 {offsets = [0, 0], sizes = [8, 32], strides = [1, 1]} : vector<8x128xf32> to vector<8x32xf32>
    %209 = vector.extract_strided_slice %207 {offsets = [0, 32], sizes = [8, 32], strides = [1, 1]} : vector<8x128xf32> to vector<8x32xf32>
    %210 = vector.extract_strided_slice %200 {offsets = [0, 64], sizes = [8, 32], strides = [1, 1]} : vector<8x128xf32> to vector<8x32xf32>
    %211 = math.tanh %210 : vector<8x32xf32>
    %212 = vector.extract_strided_slice %207 {offsets = [0, 96], sizes = [8, 32], strides = [1, 1]} : vector<8x128xf32> to vector<8x32xf32>
    %213 = arith.mulf %209, %195 : vector<8x32xf32>
    %214 = arith.mulf %208, %211 : vector<8x32xf32>
    %215 = arith.addf %213, %214 : vector<8x32xf32>
    %216 = math.tanh %215 : vector<8x32xf32>
    %217 = arith.mulf %212, %216 : vector<8x32xf32>
    %218 = vector.extract_strided_slice %175 {offsets = [16, 0], sizes = [8, 128], strides = [1, 1]} : vector<64x128xf32> to vector<8x128xf32>
    %cst_58 = arith.constant dense<0.000000e+00> : vector<8x128xf32>
    %219 = tpu.matmul %217, %171, %cst_58 {dimension_numbers = #tpu.dot_dimension_numbers<[1], [0], [0], [1], [0, 0, 1, 1], [], []>} : vector<8x32xf32>, vector<32x128xf32>, vector<8x128xf32> -> vector<8x128xf32>
    %220 = arith.addf %218, %219 : vector<8x128xf32>
    %cst_59 = arith.constant 5.000000e-01 : f32
    %221 = vector.broadcast %cst_59 : f32 to vector<8x128xf32>
    %222 = arith.mulf %221, %220 : vector<8x128xf32>
    %223 = math.tanh %222 : vector<8x128xf32>
    %cst_60 = arith.constant 1.000000e+00 : f32
    %224 = vector.broadcast %cst_60 : f32 to vector<8x128xf32>
    %225 = arith.addf %223, %224 : vector<8x128xf32>
    %cst_61 = arith.constant 5.000000e-01 : f32
    %226 = vector.broadcast %cst_61 : f32 to vector<8x128xf32>
    %227 = arith.mulf %226, %225 : vector<8x128xf32>
    %228 = vector.extract_strided_slice %227 {offsets = [0, 0], sizes = [8, 32], strides = [1, 1]} : vector<8x128xf32> to vector<8x32xf32>
    %229 = vector.extract_strided_slice %227 {offsets = [0, 32], sizes = [8, 32], strides = [1, 1]} : vector<8x128xf32> to vector<8x32xf32>
    %230 = vector.extract_strided_slice %220 {offsets = [0, 64], sizes = [8, 32], strides = [1, 1]} : vector<8x128xf32> to vector<8x32xf32>
    %231 = math.tanh %230 : vector<8x32xf32>
    %232 = vector.extract_strided_slice %227 {offsets = [0, 96], sizes = [8, 32], strides = [1, 1]} : vector<8x128xf32> to vector<8x32xf32>
    %233 = arith.mulf %229, %215 : vector<8x32xf32>
    %234 = arith.mulf %228, %231 : vector<8x32xf32>
    %235 = arith.addf %233, %234 : vector<8x32xf32>
    %236 = math.tanh %235 : vector<8x32xf32>
    %237 = arith.mulf %232, %236 : vector<8x32xf32>
    %238 = vector.extract_strided_slice %175 {offsets = [24, 0], sizes = [8, 128], strides = [1, 1]} : vector<64x128xf32> to vector<8x128xf32>
    %cst_62 = arith.constant dense<0.000000e+00> : vector<8x128xf32>
    %239 = tpu.matmul %237, %171, %cst_62 {dimension_numbers = #tpu.dot_dimension_numbers<[1], [0], [0], [1], [0, 0, 1, 1], [], []>} : vector<8x32xf32>, vector<32x128xf32>, vector<8x128xf32> -> vector<8x128xf32>
    %240 = arith.addf %238, %239 : vector<8x128xf32>
    %cst_63 = arith.constant 5.000000e-01 : f32
    %241 = vector.broadcast %cst_63 : f32 to vector<8x128xf32>
    %242 = arith.mulf %241, %240 : vector<8x128xf32>
    %243 = math.tanh %242 : vector<8x128xf32>
    %cst_64 = arith.constant 1.000000e+00 : f32
    %244 = vector.broadcast %cst_64 : f32 to vector<8x128xf32>
    %245 = arith.addf %243, %244 : vector<8x128xf32>
    %cst_65 = arith.constant 5.000000e-01 : f32
    %246 = vector.broadcast %cst_65 : f32 to vector<8x128xf32>
    %247 = arith.mulf %246, %245 : vector<8x128xf32>
    %248 = vector.extract_strided_slice %247 {offsets = [0, 0], sizes = [8, 32], strides = [1, 1]} : vector<8x128xf32> to vector<8x32xf32>
    %249 = vector.extract_strided_slice %247 {offsets = [0, 32], sizes = [8, 32], strides = [1, 1]} : vector<8x128xf32> to vector<8x32xf32>
    %250 = vector.extract_strided_slice %240 {offsets = [0, 64], sizes = [8, 32], strides = [1, 1]} : vector<8x128xf32> to vector<8x32xf32>
    %251 = math.tanh %250 : vector<8x32xf32>
    %252 = vector.extract_strided_slice %247 {offsets = [0, 96], sizes = [8, 32], strides = [1, 1]} : vector<8x128xf32> to vector<8x32xf32>
    %253 = arith.mulf %249, %235 : vector<8x32xf32>
    %254 = arith.mulf %248, %251 : vector<8x32xf32>
    %255 = arith.addf %253, %254 : vector<8x32xf32>
    %256 = math.tanh %255 : vector<8x32xf32>
    %257 = arith.mulf %252, %256 : vector<8x32xf32>
    %258 = vector.extract_strided_slice %175 {offsets = [32, 0], sizes = [8, 128], strides = [1, 1]} : vector<64x128xf32> to vector<8x128xf32>
    %cst_66 = arith.constant dense<0.000000e+00> : vector<8x128xf32>
    %259 = tpu.matmul %257, %171, %cst_66 {dimension_numbers = #tpu.dot_dimension_numbers<[1], [0], [0], [1], [0, 0, 1, 1], [], []>} : vector<8x32xf32>, vector<32x128xf32>, vector<8x128xf32> -> vector<8x128xf32>
    %260 = arith.addf %258, %259 : vector<8x128xf32>
    %cst_67 = arith.constant 5.000000e-01 : f32
    %261 = vector.broadcast %cst_67 : f32 to vector<8x128xf32>
    %262 = arith.mulf %261, %260 : vector<8x128xf32>
    %263 = math.tanh %262 : vector<8x128xf32>
    %cst_68 = arith.constant 1.000000e+00 : f32
    %264 = vector.broadcast %cst_68 : f32 to vector<8x128xf32>
    %265 = arith.addf %263, %264 : vector<8x128xf32>
    %cst_69 = arith.constant 5.000000e-01 : f32
    %266 = vector.broadcast %cst_69 : f32 to vector<8x128xf32>
    %267 = arith.mulf %266, %265 : vector<8x128xf32>
    %268 = vector.extract_strided_slice %267 {offsets = [0, 0], sizes = [8, 32], strides = [1, 1]} : vector<8x128xf32> to vector<8x32xf32>
    %269 = vector.extract_strided_slice %267 {offsets = [0, 32], sizes = [8, 32], strides = [1, 1]} : vector<8x128xf32> to vector<8x32xf32>
    %270 = vector.extract_strided_slice %260 {offsets = [0, 64], sizes = [8, 32], strides = [1, 1]} : vector<8x128xf32> to vector<8x32xf32>
    %271 = math.tanh %270 : vector<8x32xf32>
    %272 = vector.extract_strided_slice %267 {offsets = [0, 96], sizes = [8, 32], strides = [1, 1]} : vector<8x128xf32> to vector<8x32xf32>
    %273 = arith.mulf %269, %255 : vector<8x32xf32>
    %274 = arith.mulf %268, %271 : vector<8x32xf32>
    %275 = arith.addf %273, %274 : vector<8x32xf32>
    %276 = math.tanh %275 : vector<8x32xf32>
    %277 = arith.mulf %272, %276 : vector<8x32xf32>
    %278 = vector.extract_strided_slice %175 {offsets = [40, 0], sizes = [8, 128], strides = [1, 1]} : vector<64x128xf32> to vector<8x128xf32>
    %cst_70 = arith.constant dense<0.000000e+00> : vector<8x128xf32>
    %279 = tpu.matmul %277, %171, %cst_70 {dimension_numbers = #tpu.dot_dimension_numbers<[1], [0], [0], [1], [0, 0, 1, 1], [], []>} : vector<8x32xf32>, vector<32x128xf32>, vector<8x128xf32> -> vector<8x128xf32>
    %280 = arith.addf %278, %279 : vector<8x128xf32>
    %cst_71 = arith.constant 5.000000e-01 : f32
    %281 = vector.broadcast %cst_71 : f32 to vector<8x128xf32>
    %282 = arith.mulf %281, %280 : vector<8x128xf32>
    %283 = math.tanh %282 : vector<8x128xf32>
    %cst_72 = arith.constant 1.000000e+00 : f32
    %284 = vector.broadcast %cst_72 : f32 to vector<8x128xf32>
    %285 = arith.addf %283, %284 : vector<8x128xf32>
    %cst_73 = arith.constant 5.000000e-01 : f32
    %286 = vector.broadcast %cst_73 : f32 to vector<8x128xf32>
    %287 = arith.mulf %286, %285 : vector<8x128xf32>
    %288 = vector.extract_strided_slice %287 {offsets = [0, 0], sizes = [8, 32], strides = [1, 1]} : vector<8x128xf32> to vector<8x32xf32>
    %289 = vector.extract_strided_slice %287 {offsets = [0, 32], sizes = [8, 32], strides = [1, 1]} : vector<8x128xf32> to vector<8x32xf32>
    %290 = vector.extract_strided_slice %280 {offsets = [0, 64], sizes = [8, 32], strides = [1, 1]} : vector<8x128xf32> to vector<8x32xf32>
    %291 = math.tanh %290 : vector<8x32xf32>
    %292 = vector.extract_strided_slice %287 {offsets = [0, 96], sizes = [8, 32], strides = [1, 1]} : vector<8x128xf32> to vector<8x32xf32>
    %293 = arith.mulf %289, %275 : vector<8x32xf32>
    %294 = arith.mulf %288, %291 : vector<8x32xf32>
    %295 = arith.addf %293, %294 : vector<8x32xf32>
    %296 = math.tanh %295 : vector<8x32xf32>
    %297 = arith.mulf %292, %296 : vector<8x32xf32>
    %298 = vector.extract_strided_slice %175 {offsets = [48, 0], sizes = [8, 128], strides = [1, 1]} : vector<64x128xf32> to vector<8x128xf32>
    %cst_74 = arith.constant dense<0.000000e+00> : vector<8x128xf32>
    %299 = tpu.matmul %297, %171, %cst_74 {dimension_numbers = #tpu.dot_dimension_numbers<[1], [0], [0], [1], [0, 0, 1, 1], [], []>} : vector<8x32xf32>, vector<32x128xf32>, vector<8x128xf32> -> vector<8x128xf32>
    %300 = arith.addf %298, %299 : vector<8x128xf32>
    %cst_75 = arith.constant 5.000000e-01 : f32
    %301 = vector.broadcast %cst_75 : f32 to vector<8x128xf32>
    %302 = arith.mulf %301, %300 : vector<8x128xf32>
    %303 = math.tanh %302 : vector<8x128xf32>
    %cst_76 = arith.constant 1.000000e+00 : f32
    %304 = vector.broadcast %cst_76 : f32 to vector<8x128xf32>
    %305 = arith.addf %303, %304 : vector<8x128xf32>
    %cst_77 = arith.constant 5.000000e-01 : f32
    %306 = vector.broadcast %cst_77 : f32 to vector<8x128xf32>
    %307 = arith.mulf %306, %305 : vector<8x128xf32>
    %308 = vector.extract_strided_slice %307 {offsets = [0, 0], sizes = [8, 32], strides = [1, 1]} : vector<8x128xf32> to vector<8x32xf32>
    %309 = vector.extract_strided_slice %307 {offsets = [0, 32], sizes = [8, 32], strides = [1, 1]} : vector<8x128xf32> to vector<8x32xf32>
    %310 = vector.extract_strided_slice %300 {offsets = [0, 64], sizes = [8, 32], strides = [1, 1]} : vector<8x128xf32> to vector<8x32xf32>
    %311 = math.tanh %310 : vector<8x32xf32>
    %312 = vector.extract_strided_slice %307 {offsets = [0, 96], sizes = [8, 32], strides = [1, 1]} : vector<8x128xf32> to vector<8x32xf32>
    %313 = arith.mulf %309, %295 : vector<8x32xf32>
    %314 = arith.mulf %308, %311 : vector<8x32xf32>
    %315 = arith.addf %313, %314 : vector<8x32xf32>
    %316 = math.tanh %315 : vector<8x32xf32>
    %317 = arith.mulf %312, %316 : vector<8x32xf32>
    %318 = vector.extract_strided_slice %175 {offsets = [56, 0], sizes = [8, 128], strides = [1, 1]} : vector<64x128xf32> to vector<8x128xf32>
    %cst_78 = arith.constant dense<0.000000e+00> : vector<8x128xf32>
    %319 = tpu.matmul %317, %171, %cst_78 {dimension_numbers = #tpu.dot_dimension_numbers<[1], [0], [0], [1], [0, 0, 1, 1], [], []>} : vector<8x32xf32>, vector<32x128xf32>, vector<8x128xf32> -> vector<8x128xf32>
    %320 = arith.addf %318, %319 : vector<8x128xf32>
    %cst_79 = arith.constant 5.000000e-01 : f32
    %321 = vector.broadcast %cst_79 : f32 to vector<8x128xf32>
    %322 = arith.mulf %321, %320 : vector<8x128xf32>
    %323 = math.tanh %322 : vector<8x128xf32>
    %cst_80 = arith.constant 1.000000e+00 : f32
    %324 = vector.broadcast %cst_80 : f32 to vector<8x128xf32>
    %325 = arith.addf %323, %324 : vector<8x128xf32>
    %cst_81 = arith.constant 5.000000e-01 : f32
    %326 = vector.broadcast %cst_81 : f32 to vector<8x128xf32>
    %327 = arith.mulf %326, %325 : vector<8x128xf32>
    %328 = vector.extract_strided_slice %327 {offsets = [0, 0], sizes = [8, 32], strides = [1, 1]} : vector<8x128xf32> to vector<8x32xf32>
    %329 = vector.extract_strided_slice %327 {offsets = [0, 32], sizes = [8, 32], strides = [1, 1]} : vector<8x128xf32> to vector<8x32xf32>
    %330 = vector.extract_strided_slice %320 {offsets = [0, 64], sizes = [8, 32], strides = [1, 1]} : vector<8x128xf32> to vector<8x32xf32>
    %331 = math.tanh %330 : vector<8x32xf32>
    %332 = vector.extract_strided_slice %327 {offsets = [0, 96], sizes = [8, 32], strides = [1, 1]} : vector<8x128xf32> to vector<8x32xf32>
    %333 = arith.mulf %329, %315 : vector<8x32xf32>
    %334 = arith.mulf %328, %331 : vector<8x32xf32>
    %335 = arith.addf %333, %334 : vector<8x32xf32>
    %336 = math.tanh %335 : vector<8x32xf32>
    %337 = arith.mulf %332, %336 : vector<8x32xf32>
    %338 = tpu.concatenate %197, %217, %237, %257, %277, %297, %317, %337 in 1 : vector<8x32xf32>, vector<8x32xf32>, vector<8x32xf32>, vector<8x32xf32>, vector<8x32xf32>, vector<8x32xf32>, vector<8x32xf32>, vector<8x32xf32> -> vector<8x256xf32>
    %c0_82 = arith.constant 0 : index
    %c0_83 = arith.constant 0 : index
    %339 = vector.load %arg7[%c0_82, %c0_83] : memref<8x256xf32, #tpu.memory_space<vmem>>, vector<8x256xf32>
    tpu.vector_store %arg7[%c0_82, %c0_83], %338 {strides = array<i32>} : memref<8x256xf32, #tpu.memory_space<vmem>>, vector<8x256xf32>,
    return
  }
}

</mosaic_0001>

<bundles_post_ra>
// kernel: tpu_custom_call.1
= control target key start
LH: loop header
LB: loop body
LE: loop exit
PB: predicated region body
PF: predicated region fallthrough
CT: control target
= control target key end

     0   :  { %12 = vsyncpa [#allocation3], 0  ;;  %s2954_s0 = inlined_call_operand.vmem [shape: f32[64,4], index: 0, kind: input, shape index: {}]   ;;  %s2955_s1 = inlined_call_operand.vmem [shape: f32[4,128], index: 1, kind: input, shape index: {}]   ;;  %s2956_s2 = inlined_call_operand.vmem [shape: f32[32,128], index: 2, kind: input, shape index: {}]   ;;  %s2957_s3 = inlined_call_operand.vmem [shape: f32[1,128], index: 3, kind: input, shape index: {}]   ;;  %s2958_s4 = inlined_call_operand.vmem [shape: f32[32,128], index: 4, kind: input, shape index: {}]   ;;  %s2959_s5 = inlined_call_operand.hbm [shape: f32[32,128], index: 5, kind: input, shape index: {}]   ;;  %s2960_s6 = inlined_call_operand.vmem [shape: f32[1,128], index: 6, kind: input, shape index: {}]   ;;  %s2961_s7 = inlined_call_operand.hbm [shape: f32[8,256], index: 7, kind: output, shape index: {}]  }
   0x1   :  { %13 = vsyncpa [#allocation4], 0  ;;  %s2523_s24 = smov [#allocation2]   ;;  %s2475_s28 = scalar_lea.hbm %s2959_s5, 512 }
   0x2   :  { %s29_s25 = sshll.u32 %s2523_s24, 4  ;;  %p2476_p0 = scmp.ne.s32.totalorder %s2959_s5, %s2475_s28  ;;  %s30_s25 = int_to_ptr.vmem [resolvable:$true] %s29_s25 }
   0x3   :  { %p2479_p1 = scmp.lt.u32.totalorder %s2475_s28, %s2959_s5 }
   0x5   :  { %p2481_p2 = pnand %p2479_p1, %p2476_p0 }
   0x7   :  { %2484 = shalt.err (!%p2481_p2)
}
   0x8   :  { %s2485_s10 = scalar_lea.vmem %s30_s25, 512  ;;  %p2490_p4 = scmp.lt.s32.totalorder %s30_s25, %s30_s25 }
   0x9   :  { %p2486_p3 = scmp.ne.s32.totalorder %s30_s25, %s2485_s10  ;;  %p2491_p5 = scmp.lt.s32.totalorder %s2485_s10, %s2485_s10 }
   0xb   :  { %p2492_p6 = por %p2491_p5, %p2490_p4 }
   0xd   :  { %p2493_p7 = pnand %p2492_p6, %p2486_p3 }
   0xf   :  { %2496 = shalt.err (!%p2493_p7)
}
  0x10   :  { %s2524_s11 = smov 128   ;;  %s2525_s12 = smov 8  }
  0x11   :  { %35 = dma.hbm_to_vmem [thread:$0]  %s2959_s5, 512, %s30_s25, [#allocation3], %s2524_s11, %s2524_s11, %s2525_s12  }
  0x12   :  { %2519 = dma.done.wait [#allocation3], 512  }
  0x13   :  { %2520 = vsyncadd [#allocation3], 4294966784  ;;  %v2526_v0 = vmov 0.0|0.0   ;;  %vm2527_vm0 = vmmov 0   ;;  %v2528_v1 = vmov 0.0   ;;  %vm86_vm1 = vcmask 1043456  }
  0x14   :  { %2265 = vmatprep.subr.bf16.mxu1 %v2526_v0  ;;  %2077 = vmatprep.mubr.msk.f32.mxu1 %vm2527_vm0, %v2528_v1  ;;  %vm61_vm2 = vcmask 31744   ;;  %v50_v2 = vld [vmem:[%s2956_s2] sm:$0xff]  ;;  %v51_v3 = vld [vmem:[%s2956_s2 + $0x8] sm:$0xff]  ;;  %v52_v8 = vld [vmem:[%s2956_s2 + $0x10] sm:$0xff]  ;;  %s2529_s28 = smov 64   ;;  %vm195_vm3 = vcmask 261120  }
  0x15   :  { %v49_v4 = vld [vmem:[%s2955_s1] sm:$0xf]  ;;  %v2597_v5 = vpack.c.bf16 %v51_v3, %v50_v2  ;;  %v42_v7 = vld [vmem:[%s2954_s0 + $0x8] sm:$0xff]  ;;  %v53_v9 = vld [vmem:[%s2956_s2 + $0x18] sm:$0xff]  ;;  %vm1897_vm4 = vcmask 523264   ;;  %vm1899_vm5 = vcmask 785408  }
  0x16   :  { %2055 = vmatprep.subr.msk.mxu0 %vm86_vm1, %v49_v4  ;;  %v41_v6 = vld [vmem:[%s2954_s0] sm:$0xff]  ;;  %v2614_v10 = vpack.c.bf16 %v53_v9, %v52_v8  ;;  %v43_v46 = vld [vmem:[%s2954_s0 + $0x10] sm:$0xff]  ;;  %v44_v47 = vld [vmem:[%s2954_s0 + $0x18] sm:$0xff]  ;;  %s2532_s25 = smov [#allocation5]  }
  0x17   :  { %2056 = vmatpush3.msk.msra.mxu0 %vm86_vm1, %v49_v4  ;;  %2057 = vmatprep.mubr.msk.f32.mxu0 %vm61_vm2, %v41_v6  ;;  %v2634_v12 = vld [vmem:[%s2957_s3] ss:$0 sm:$0xff]  ;;  %s2530_s3 = smov 32   ;;  %v46_v49 = vld [vmem:[%s2954_s0 + $0x28] sm:$0xff]  ;;  %v47_v50 = vld [vmem:[%s2954_s0 + $0x30] sm:$0xff]  ;;  %s1912_s26 = sshll.u32 %s2532_s25, 4  ;;  %s1913_s26 = int_to_ptr.vmem [resolvable:$true] %s1912_s26 }
  0x18   :  { %2267 = vmatpush3.bf16.msra.mxu1 %v2597_v5  ;;  %2058 = vmatmul.mubr.msk.f32.vlgmr.msra.gmra.mrb[0].mxu0 %vm61_vm2, %v42_v7  ;;  %v45_v48 = vld [vmem:[%s2954_s0 + $0x20] sm:$0xff]  ;;  %v48_v51 = vld [vmem:[%s2954_s0 + $0x38] sm:$0xff]  ;;  %s2497_s1 = scalar_lea.vmem %s1913_s26, 256  ;;  %p2502_p9 = scmp.lt.s32.totalorder %s1913_s26, %s1913_s26 }
  0x19   :  { %2268 = vmatprep.subr.bf16.mxu1 %v2526_v0  ;;  %2277 = vmatprep.subr.bf16.mxu0 %v2526_v0  ;;  %p2498_p8 = scmp.ne.s32.totalorder %s1913_s26, %s2497_s1  ;;  %p2503_p10 = scmp.lt.s32.totalorder %s2497_s1, %s2497_s1 }
  0x1a   :  { %2279 = vmatpush3.bf16.msra.mxu0 %v2597_v5  ;;  %2060 = vmatprep.mubr.msk.f32.mxu0 %vm61_vm2, %v43_v46 }
  0x1b   :  { %2280 = vmatprep.subr.bf16.mxu0 %v2526_v0  ;;  %p2504_p11 = por %p2503_p10, %p2502_p9 }
  0x1c   :  { %2270 = vmatpush3.bf16.msra.mxu1 %v2614_v10  ;;  %2061 = vmatmul.mubr.msk.f32.gmra.mrb[2].mxu0 %vm61_vm2, %v44_v47 }
  0x1d   :  { %2271 = vmatprep.subr.bf16.mxu1 %v2526_v0  ;;  %2063 = vmatprep.mubr.msk.f32.mxu0 %vm61_vm2, %v45_v48  ;;  %p2505_p12 = pnand %p2504_p11, %p2498_p8 }
  0x1e   :  { %2282 = vmatpush3.bf16.msra.mxu0 %v2614_v10 }
  0x1f   :  { %2078 = vmatmul.mubr.f32.vlgmr.msra.gmra.mrb[0].mxu1 %v2528_v1  ;;  %2289 = vmatprep.subr.bf16.mxu0 %v2526_v0 }
  0x20   :  { %2273 = vmatpush3.bf16.msra.mxu1 %v2597_v5  ;;  %2088 = vmatprep.mubr.msk.f32.mxu1 %vm2527_vm0, %v2528_v1 }
  0x21   :  { %2274 = vmatprep.subr.bf16.mxu1 %v2526_v0  ;;  %2064 = vmatmul.mubr.msk.f32.gmra.mrb[4].mxu0 %vm61_vm2, %v46_v49 }
  0x22   :  { %2066 = vmatprep.mubr.msk.f32.mxu0 %vm61_vm2, %v47_v50 }
  0x24   :  { %2276 = vmatpush3.bf16.msra.mxu1 %v2614_v10 }
  0x25   :  { %2283 = vmatprep.subr.bf16.mxu1 %v2526_v0  ;;  %2067 = vmatmul.mubr.msk.f32.gmra.mrb[6].mxu0 %vm61_vm2, %v48_v51 }
  0x26   :  { %2099 = vmatprep.mubr.msk.f32.mxu0 %vm2527_vm0, %v2528_v1 }
  0xeb   :  { %v2059_v11 = vpop.f32.mrb[0].mxu0 }
  0xec   :  { %v156_v13 = vpop.f32.mrb[1].mxu0  ;;  %v162_v32 = vadd.f32 %v2059_v11, %v2634_v12 }
  0xed   :  { %v157_v14 = vadd.f32 %v2634_v12, %v156_v13 }
  0xef   :  { %v2062_v55 = vpop.f32.mrb[2].mxu0 }
  0xf0   :  { %v166_v56 = vpop.f32.mrb[3].mxu0 }
  0xf1   :  { %v167_v62 = vadd.f32 %v2634_v12, %v166_v56 }
  0xf2   :  { %v265_v15 = vpop.f32.mrb[0].mxu1 }
  0xf3   :  { %v269_v16 = vadd.f32 %v265_v15, %v157_v14  ;;  %v2079_v17 = vpop.f32.mrb[1].mxu1 }
  0xf4   :  { %v2682_v57 = vpop.f32.mrb[4].mxu0 }
  0xf5   :  { %2379 = vtanh.f32 %v269_v16  ;;  %v270_v19 = vmul.f32 0.5, %v269_v16  ;;  %v2684_v58 = vpop.f32.mrb[5].mxu0 }
  0xf7   :  { %2381 = vtanh.f32 %v270_v19 }
  0xf8   :  { %v2686_v59 = vpop.f32.mrb[6].mxu0 }
  0xf9   :  { %v2688_v60 = vpop.f32.mrb[7].mxu0 }
  0xff   :  { %v2380_v18 = vpop.eup %2379 }
 0x100   :  { %277 = vrot.lane.b32.xlu0 %v2380_v18, %s2529_s28 }
 0x101   :  { %v2382_v20 = vpop.eup %2381 }
 0x102   :  { %v272_v21 = vadd.f32 1.0, %v2382_v20 }
 0x104   :  { %v273_v22 = vmul.f32 0.5, %v272_v21  ;;  %v172_v21 = vadd.f32 %v2062_v55, %v2634_v12 }
 0x106   :  { %v275_v25 = vmul.f32 0.0, %v273_v22 }
 0x172   :  { %v278_v23 = vpop.permute.xlu0 %277 }
 0x173   :  { %v280_v24 = vmul.f32 %v278_v23, %v273_v22 }
 0x175   :  { %282 = vrot.lane.b32.xlu0 %v280_v24, %s2530_s3 }
 0x1e7   :  { %v283_v26 = vpop.permute.xlu0 %282 }
 0x1e8   :  { %v285_v27 = vadd.f32 %v283_v26, %v275_v25 }
 0x1ea   :  { %2383 = vtanh.f32 %v285_v27 }
 0x1f4   :  { %v2384_v28 = vpop.eup %2383 }
 0x1f5   :  { %288 = vrot.lane.b32.xlu1 %v2384_v28, %s2529_s28 }
 0x267   :  { %v289_v29 = vpop.permute.xlu1 %288 }
 0x268   :  { %v291_v30 = vmul.f32 %v289_v29, %v273_v22 }
 0x26a   :  { %293 = vrot.lane.b32.xlu1 %v291_v30, %s2530_s3 }
 0x2dc   :  { %v2641_v31 = vpop.permute.xlu1 %293 }
 0x2dd   :  { %2089 = vmatmul.mubr.msk.f32.vlgmr.msra.gmra.mrb[2].mxu1 %vm195_vm3, %v2641_v31 }
 0x2de   :  { %2285 = vmatpush3.bf16.msra.mxu1 %v2597_v5  ;;  %2110 = vmatprep.mubr.msk.f32.mxu1 %vm2527_vm0, %v2528_v1 }
 0x2df   :  { %2286 = vmatprep.subr.bf16.mxu1 %v2526_v0 }
 0x2e2   :  { %2288 = vmatpush3.bf16.msra.mxu1 %v2614_v10 }
 0x2e3   :  { %2295 = vmatprep.subr.bf16.mxu1 %v2526_v0 }
 0x3b0   :  { %v363_v33 = vpop.f32.mrb[2].mxu1 }
 0x3b1   :  { %v367_v34 = vadd.f32 %v363_v33, %v162_v32  ;;  %v2090_v35 = vpop.f32.mrb[3].mxu1 }
 0x3b3   :  { %2385 = vtanh.f32 %v367_v34  ;;  %v368_v37 = vmul.f32 0.5, %v367_v34 }
 0x3b5   :  { %2387 = vtanh.f32 %v368_v37 }
 0x3bd   :  { %v2386_v36 = vpop.eup %2385 }
 0x3be   :  { %375 = vrot.lane.b32.xlu0 %v2386_v36, %s2529_s28 }
 0x3bf   :  { %v2388_v38 = vpop.eup %2387 }
 0x3c0   :  { %v370_v39 = vadd.f32 1.0, %v2388_v38 }
 0x3c2   :  { %v371_v40 = vmul.f32 0.5, %v370_v39 }
 0x3c4   :  { %v373_v43 = vmul.f32 %v371_v40, %v285_v27 }
 0x430   :  { %v376_v41 = vpop.permute.xlu0 %375 }
 0x431   :  { %v378_v42 = vmul.f32 %v376_v41, %v371_v40 }
 0x433   :  { %380 = vrot.lane.b32.xlu1 %v378_v42, %s2530_s3 }
 0x4a5   :  { %v381_v44 = vpop.permute.xlu1 %380 }
 0x4a6   :  { %v383_v45 = vadd.f32 %v381_v44, %v373_v43 }
 0x4a8   :  { %2389 = vtanh.f32 %v383_v45 }
 0x4b2   :  { %v2390_v52 = vpop.eup %2389 }
 0x4b3   :  { %386 = vrot.lane.b32.xlu0 %v2390_v52, %s2529_s28 }
 0x525   :  { %v387_v53 = vpop.permute.xlu0 %386 }
 0x526   :  { %v389_v54 = vmul.f32 %v387_v53, %v371_v40  ;;  %v177_v40 = vadd.f32 %v2634_v12, %v2684_v58 }
 0x528   :  { %391 = vrot.lane.b32.xlu1 %v389_v54, %s2530_s3 }
 0x59a   :  { %v2690_v61 = vpop.permute.xlu1 %391 }
 0x59b   :  { %2100 = vmatmul.mubr.msk.f32.vlgmr.msra.gmra.mrb[8].mxu0 %vm195_vm3, %v2690_v61 }
 0x59c   :  { %2291 = vmatpush3.bf16.msra.mxu0 %v2597_v5  ;;  %2121 = vmatprep.mubr.msk.f32.mxu0 %vm2527_vm0, %v2528_v1 }
 0x59d   :  { %2292 = vmatprep.subr.bf16.mxu0 %v2526_v0 }
 0x5a0   :  { %2294 = vmatpush3.bf16.msra.mxu0 %v2614_v10 }
 0x5a1   :  { %2301 = vmatprep.subr.bf16.mxu0 %v2526_v0 }
 0x66e   :  { %v461_v63 = vpop.f32.mrb[8].mxu0 }
 0x66f   :  { %v465_v2 = vadd.f32 %v461_v63, %v167_v62  ;;  %v2101_v3 = vpop.f32.mrb[9].mxu0  ;;  %v182_v62 = vadd.f32 %v2682_v57, %v2634_v12  ;;  %v978_v57 = vld [vmem:[%s2958_s4] sm:$0xff] }
 0x671   :  { %2391 = vtanh.f32 %v465_v2  ;;  %v466_v6 = vmul.f32 0.5, %v465_v2 }
 0x673   :  { %2393 = vtanh.f32 %v466_v6 }
 0x67b   :  { %v2392_v4 = vpop.eup %2391 }
 0x67c   :  { %473 = vrot.lane.b32.xlu0 %v2392_v4, %s2529_s28 }
 0x67d   :  { %v2394_v7 = vpop.eup %2393 }
 0x67e   :  { %v468_v8 = vadd.f32 1.0, %v2394_v7 }
 0x680   :  { %v469_v9 = vmul.f32 0.5, %v468_v8 }
 0x682   :  { %v471_v14 = vmul.f32 %v469_v9, %v383_v45 }
 0x6ee   :  { %v474_v11 = vpop.permute.xlu0 %473 }
 0x6ef   :  { %v476_v13 = vmul.f32 %v474_v11, %v469_v9 }
 0x6f1   :  { %478 = vrot.lane.b32.xlu1 %v476_v13, %s2530_s3 }
 0x763   :  { %v479_v15 = vpop.permute.xlu1 %478 }
 0x764   :  { %v481_v16 = vadd.f32 %v479_v15, %v471_v14  ;;  %v979_v15 = vld [vmem:[%s2958_s4 + $0x8] sm:$0xff] }
 0x766   :  { %2395 = vtanh.f32 %v481_v16 }
 0x770   :  { %v2396_v17 = vpop.eup %2395 }
 0x771   :  { %484 = vrot.lane.b32.xlu0 %v2396_v17, %s2529_s28 }
 0x7e3   :  { %v485_v18 = vpop.permute.xlu0 %484 }
 0x7e4   :  { %v487_v19 = vmul.f32 %v485_v18, %v469_v9 }
 0x7e6   :  { %489 = vrot.lane.b32.xlu1 %v487_v19, %s2530_s3 }
 0x858   :  { %v2705_v20 = vpop.permute.xlu1 %489 }
 0x859   :  { %2111 = vmatmul.mubr.msk.f32.vlgmr.msra.gmra.mrb[4].mxu1 %vm195_vm3, %v2705_v20 }
 0x85a   :  { %2297 = vmatpush3.bf16.msra.mxu1 %v2597_v5  ;;  %2132 = vmatprep.mubr.msk.f32.mxu1 %vm2527_vm0, %v2528_v1 }
 0x85b   :  { %2298 = vmatprep.subr.bf16.mxu1 %v2526_v0 }
 0x85e   :  { %2300 = vmatpush3.bf16.msra.mxu1 %v2614_v10 }
 0x85f   :  { %2307 = vmatprep.subr.bf16.mxu1 %v2526_v0 }
 0x92c   :  { %v559_v22 = vpop.f32.mrb[4].mxu1 }
 0x92d   :  { %v563_v23 = vadd.f32 %v559_v22, %v172_v21  ;;  %v2112_v24 = vpop.f32.mrb[5].mxu1  ;;  %v980_v21 = vld [vmem:[%s2958_s4 + $0x10] sm:$0xff]  ;;  %v981_v22 = vld [vmem:[%s2958_s4 + $0x18] sm:$0xff] }
 0x92f   :  { %2397 = vtanh.f32 %v563_v23  ;;  %v564_v26 = vmul.f32 0.5, %v563_v23  ;;  %v2317_v23 = vpack.c.bf16 %v981_v22, %v980_v21 }
 0x931   :  { %2399 = vtanh.f32 %v564_v26 }
 0x939   :  { %v2398_v25 = vpop.eup %2397 }
 0x93a   :  { %571 = vrot.lane.b32.xlu0 %v2398_v25, %s2529_s28 }
 0x93b   :  { %v2400_v27 = vpop.eup %2399 }
 0x93c   :  { %v566_v28 = vadd.f32 1.0, %v2400_v27 }
 0x93e   :  { %v567_v29 = vmul.f32 0.5, %v566_v28 }
 0x940   :  { %v569_v33 = vmul.f32 %v567_v29, %v481_v16  ;;  %v2313_v16 = vpack.c.bf16 %v979_v15, %v978_v57 }
 0x9ac   :  { %v572_v30 = vpop.permute.xlu0 %571 }
 0x9ad   :  { %v574_v32 = vmul.f32 %v572_v30, %v567_v29 }
 0x9af   :  { %576 = vrot.lane.b32.xlu1 %v574_v32, %s2530_s3 }
 0xa21   :  { %v577_v34 = vpop.permute.xlu1 %576 }
 0xa22   :  { %v579_v35 = vadd.f32 %v577_v34, %v569_v33 }
 0xa24   :  { %2401 = vtanh.f32 %v579_v35 }
 0xa2e   :  { %v2402_v36 = vpop.eup %2401 }
 0xa2f   :  { %582 = vrot.lane.b32.xlu0 %v2402_v36, %s2529_s28 }
 0xaa1   :  { %v583_v37 = vpop.permute.xlu0 %582 }
 0xaa2   :  { %v585_v38 = vmul.f32 %v583_v37, %v567_v29 }
 0xaa4   :  { %587 = vrot.lane.b32.xlu1 %v585_v38, %s2530_s3 }
 0xb16   :  { %v2720_v39 = vpop.permute.xlu1 %587 }
 0xb17   :  { %2122 = vmatmul.mubr.msk.f32.vlgmr.msra.gmra.mrb[10].mxu0 %vm195_vm3, %v2720_v39 }
 0xb18   :  { %2303 = vmatpush3.bf16.msra.mxu0 %v2597_v5  ;;  %2143 = vmatprep.mubr.msk.f32.mxu0 %vm2527_vm0, %v2528_v1 }
 0xb19   :  { %2304 = vmatprep.subr.bf16.mxu0 %v2526_v0 }
 0xb1c   :  { %2306 = vmatpush3.bf16.msra.mxu0 %v2614_v10 }
 0xb1d   :  { %2314 = vmatprep.subr.bf16.mxu0 %v2313_v16 }
 0xbea   :  { %v657_v41 = vpop.f32.mrb[10].mxu0 }
 0xbeb   :  { %v661_v42 = vadd.f32 %v657_v41, %v177_v40  ;;  %v2123_v43 = vpop.f32.mrb[11].mxu0 }
 0xbec   :  { %v982_v43 = vld [vmem:[#allocation2] sm:$0xff] }
 0xbed   :  { %2403 = vtanh.f32 %v661_v42  ;;  %v662_v45 = vmul.f32 0.5, %v661_v42 }
 0xbef   :  { %2405 = vtanh.f32 %v662_v45 }
 0xbf7   :  { %v2404_v44 = vpop.eup %2403 }
 0xbf8   :  { %669 = vrot.lane.b32.xlu0 %v2404_v44, %s2529_s28  ;;  %v983_v44 = vld [vmem:[#allocation2 + $0x8] sm:$0xff] }
 0xbf9   :  { %v2406_v46 = vpop.eup %2405  ;;  %v2790_v45 = vpack.c.bf16 %v983_v44, %v982_v43 }
 0xbfa   :  { %v664_v47 = vadd.f32 1.0, %v2406_v46  ;;  %v984_v46 = vld [vmem:[#allocation2 + $0x10] sm:$0xff] }
 0xbfc   :  { %v665_v48 = vmul.f32 0.5, %v664_v47  ;;  %v985_v47 = vld [vmem:[#allocation2 + $0x18] sm:$0xff] }
 0xbfe   :  { %v667_v51 = vmul.f32 %v665_v48, %v579_v35 }
 0xc6a   :  { %v670_v49 = vpop.permute.xlu0 %669 }
 0xc6b   :  { %v672_v50 = vmul.f32 %v670_v49, %v665_v48 }
 0xc6d   :  { %674 = vrot.lane.b32.xlu1 %v672_v50, %s2530_s3 }
 0xcdf   :  { %v675_v52 = vpop.permute.xlu1 %674 }
 0xce0   :  { %v677_v53 = vadd.f32 %v675_v52, %v667_v51  ;;  %v192_v52 = vadd.f32 %v2686_v59, %v2634_v12 }
 0xce2   :  { %2407 = vtanh.f32 %v677_v53 }
 0xcec   :  { %v2408_v54 = vpop.eup %2407 }
 0xced   :  { %680 = vrot.lane.b32.xlu0 %v2408_v54, %s2529_s28 }
 0xd5f   :  { %v681_v55 = vpop.permute.xlu0 %680 }
 0xd60   :  { %v683_v56 = vmul.f32 %v681_v55, %v665_v48  ;;  %v2794_v48 = vpack.c.bf16 %v985_v47, %v984_v46 }
 0xd62   :  { %685 = vrot.lane.b32.xlu1 %v683_v56, %s2530_s3  ;;  %v2819_v56 = vld [vmem:[%s2960_s6] ss:$0 sm:$0xff]  ;;  %s2531_s6 = smov 96  }
 0xdd4   :  { %v686_v58 = vpop.permute.xlu1 %685 }
 0xdd5   :  { %2133 = vmatmul.mubr.msk.f32.vlgmr.msra.gmra.mrb[6].mxu1 %vm195_vm3, %v686_v58 }
 0xdd6   :  { %2309 = vmatpush3.bf16.msra.mxu1 %v2597_v5  ;;  %2154 = vmatprep.mubr.msk.f32.mxu1 %vm2527_vm0, %v2528_v1 }
 0xdd7   :  { %2310 = vmatprep.subr.bf16.mxu1 %v2526_v0 }
 0xdda   :  { %2312 = vmatpush3.bf16.msra.mxu1 %v2614_v10 }
 0xddb   :  { %2321 = vmatprep.subr.bf16.mxu1 %v2526_v0 }
 0xea8   :  { %v755_v63 = vpop.f32.mrb[6].mxu1 }
 0xea9   :  { %v759_v2 = vadd.f32 %v755_v63, %v182_v62  ;;  %v2134_v3 = vpop.f32.mrb[7].mxu1 }
 0xeab   :  { %2409 = vtanh.f32 %v759_v2  ;;  %v760_v5 = vmul.f32 0.5, %v759_v2 }
 0xead   :  { %2411 = vtanh.f32 %v760_v5 }
 0xeb5   :  { %v2410_v4 = vpop.eup %2409 }
 0xeb6   :  { %767 = vrot.lane.b32.xlu0 %v2410_v4, %s2529_s28 }
 0xeb7   :  { %v2412_v6 = vpop.eup %2411 }
 0xeb8   :  { %v762_v7 = vadd.f32 1.0, %v2412_v6 }
 0xeba   :  { %v763_v8 = vmul.f32 0.5, %v762_v7 }
 0xebc   :  { %v765_v10 = vmul.f32 %v763_v8, %v677_v53 }
 0xf28   :  { %v768_v9 = vpop.permute.xlu0 %767 }
 0xf29   :  { %v770_v11 = vmul.f32 %v768_v9, %v763_v8 }
 0xf2b   :  { %772 = vrot.lane.b32.xlu1 %v770_v11, %s2530_s3 }
 0xf9d   :  { %v773_v13 = vpop.permute.xlu1 %772 }
 0xf9e   :  { %v775_v14 = vadd.f32 %v773_v13, %v765_v10 }
 0xfa0   :  { %2413 = vtanh.f32 %v775_v14 }
 0xfaa   :  { %v2414_v17 = vpop.eup %2413 }
 0xfab   :  { %778 = vrot.lane.b32.xlu0 %v2414_v17, %s2529_s28 }
0x101d   :  { %v779_v18 = vpop.permute.xlu0 %778 }
0x101e   :  { %v781_v19 = vmul.f32 %v779_v18, %v763_v8 }
0x1020   :  { %783 = vrot.lane.b32.xlu1 %v781_v19, %s2530_s3 }
0x1092   :  { %v784_v24 = vpop.permute.xlu1 %783 }
0x1093   :  { %2144 = vmatmul.mubr.msk.f32.vlgmr.msra.gmra.mrb[12].mxu0 %vm195_vm3, %v784_v24 }
0x1094   :  { %2316 = vmatpush3.bf16.msra.mxu0 %v2313_v16  ;;  %2165 = vmatprep.mubr.msk.f32.mxu0 %vm195_vm3, %v2641_v31  ;;  %v187_v31 = vadd.f32 %v2634_v12, %v2688_v60 }
0x1095   :  { %2318 = vmatprep.subr.bf16.mxu0 %v2317_v23 }
0x1098   :  { %2320 = vmatpush3.bf16.msra.mxu0 %v2317_v23 }
0x1099   :  { %2333 = vmatprep.subr.bf16.mxu0 %v2526_v0 }
0x109b   :  { %2166 = vmatmul.mubr.msk.f32.vlgmr.msra.gmra.mrb[14].mxu0 %vm195_vm3, %v2690_v61 }
0x109c   :  { %2168 = vmatprep.mubr.msk.f32.mxu0 %vm195_vm3, %v2705_v20  ;;  %2335 = vmatpush3.bf16.msra.mxu0 %v2790_v45 }
0x109d   :  { %2336 = vmatprep.subr.bf16.mxu0 %v2526_v0 }
0x109f   :  { %2169 = vmatmul.mubr.msk.f32.gmra.mrb[16].mxu0 %vm195_vm3, %v2720_v39 }
0x10a0   :  { %2171 = vmatprep.mubr.msk.f32.mxu0 %vm195_vm3, %v686_v58  ;;  %2338 = vmatpush3.bf16.msra.mxu0 %v2794_v48 }
0x10a1   :  { %2345 = vmatprep.subr.bf16.mxu0 %v2526_v0 }
0x10a3   :  { %2172 = vmatmul.mubr.msk.f32.gmra.mrb[18].mxu0 %vm195_vm3, %v784_v24 }
0x1166   :  { %v853_v25 = vpop.f32.mrb[12].mxu0 }
0x1167   :  { %v857_v26 = vadd.f32 %v853_v25, %v187_v31  ;;  %v2145_v27 = vpop.f32.mrb[13].mxu0 }
0x1169   :  { %2415 = vtanh.f32 %v857_v26  ;;  %v858_v34 = vmul.f32 0.5, %v857_v26 }
0x116b   :  { %2417 = vtanh.f32 %v858_v34 }
0x116e   :  { %v2774_v28 = vpop.f32.mrb[14].mxu0 }
0x116f   :  { %v1064_v61 = vpop.f32.mrb[15].mxu0 }
0x1170   :  { %v1065_v58 = vadd.f32 %v2819_v56, %v1064_v61  ;;  %v1070_v61 = vadd.f32 %v2774_v28, %v2819_v56 }
0x1172   :  { %v2776_v29 = vpop.f32.mrb[16].mxu0 }
0x1173   :  { %v2416_v20 = vpop.eup %2415  ;;  %v2778_v30 = vpop.f32.mrb[17].mxu0 }
0x1174   :  { %865 = vrot.lane.b32.xlu0 %v2416_v20, %s2529_s28 }
0x1175   :  { %v2418_v60 = vpop.eup %2417 }
0x1176   :  { %v2781_v32 = vpop.f32.mrb[18].mxu0  ;;  %v860_v35 = vadd.f32 1.0, %v2418_v60 }
0x1177   :  { %v2783_v33 = vpop.f32.mrb[19].mxu0 }
0x1178   :  { %v861_v36 = vmul.f32 0.5, %v860_v35 }
0x117a   :  { %v863_v39 = vmul.f32 %v861_v36, %v775_v14 }
0x11e6   :  { %v866_v37 = vpop.permute.xlu0 %865 }
0x11e7   :  { %v868_v38 = vmul.f32 %v866_v37, %v861_v36 }
0x11e9   :  { %870 = vrot.lane.b32.xlu1 %v868_v38, %s2530_s3 }
0x125b   :  { %v871_v40 = vpop.permute.xlu1 %870 }
0x125c   :  { %v2786_v41 = vadd.f32 %v871_v40, %v863_v39 }
0x125e   :  { %2419 = vtanh.f32 %v2786_v41 }
0x1268   :  { %v2420_v42 = vpop.eup %2419 }
0x1269   :  { %876 = vrot.lane.b32.xlu0 %v2420_v42, %s2529_s28 }
0x12db   :  { %v877_v49 = vpop.permute.xlu0 %876 }
0x12dc   :  { %v879_v50 = vmul.f32 %v877_v49, %v861_v36 }
0x12de   :  { %881 = vrot.lane.b32.xlu1 %v879_v50, %s2530_s3 }
0x1350   :  { %v882_v51 = vpop.permute.xlu1 %881 }
0x1351   :  { %2155 = vmatmul.mubr.msk.f32.vlgmr.msra.gmra.mrb[8].mxu1 %vm195_vm3, %v882_v51  ;;  %2174 = vmatprep.mubr.msk.f32.mxu0 %vm195_vm3, %v882_v51 }
0x1352   :  { %2323 = vmatpush3.bf16.msra.mxu1 %v2790_v45  ;;  %2185 = vmatprep.mubr.msk.f32.mxu1 %vm2527_vm0, %v2528_v1 }
0x1353   :  { %2324 = vmatprep.subr.bf16.mxu1 %v2526_v0 }
0x1356   :  { %2326 = vmatpush3.bf16.msra.mxu1 %v2794_v48 }
0x1357   :  { %2327 = vmatprep.subr.bf16.mxu1 %v2526_v0 }
0x1359   :  { %2186 = vmatmul.mubr.f32.vlgmr.msra.gmra.mrb[10].mxu1 %v2528_v1 }
0x135a   :  { %2329 = vmatpush3.bf16.msra.mxu1 %v2790_v45  ;;  %2196 = vmatprep.mubr.msk.f32.mxu1 %vm2527_vm0, %v2528_v1 }
0x135b   :  { %2330 = vmatprep.subr.bf16.mxu1 %v2526_v0 }
0x135e   :  { %2332 = vmatpush3.bf16.msra.mxu1 %v2794_v48 }
0x135f   :  { %2339 = vmatprep.subr.bf16.mxu1 %v2526_v0 }
0x1424   :  { %v951_v53 = vpop.f32.mrb[8].mxu1 }
0x1425   :  { %v955_v54 = vadd.f32 %v951_v53, %v192_v52  ;;  %v2156_v55 = vpop.f32.mrb[9].mxu1  ;;  %v1075_v53 = vadd.f32 %v2819_v56, %v2778_v30 }
0x1427   :  { %v956_v14 = vmul.f32 0.5, %v955_v54 }
0x142c   :  { %v1169_v62 = vpop.f32.mrb[10].mxu1 }
0x142d   :  { %v1173_v63 = vadd.f32 %v1169_v62, %v1065_v58  ;;  %v2187_v2 = vpop.f32.mrb[11].mxu1 }
0x142f   :  { %2421 = vtanh.f32 %v1173_v63  ;;  %v1174_v4 = vmul.f32 0.5, %v1173_v63 }
0x1431   :  { %2423 = vtanh.f32 %v1174_v4 }
0x1439   :  { %v2422_v3 = vpop.eup %2421 }
0x143a   :  { %1181 = vrot.lane.b32.xlu0 %v2422_v3, %s2529_s28 }
0x143b   :  { %v2424_v12 = vpop.eup %2423 }
0x143c   :  { %v1176_v59 = vadd.f32 1.0, %v2424_v12 }
0x143e   :  { %v1177_v5 = vmul.f32 0.5, %v1176_v59 }
0x1440   :  { %v1179_v8 = vmul.f32 0.0, %v1177_v5 }
0x14ac   :  { %v1182_v6 = vpop.permute.xlu0 %1181 }
0x14ad   :  { %v1184_v7 = vmul.f32 %v1182_v6, %v1177_v5 }
0x14af   :  { %1186 = vrot.lane.b32.xlu1 %v1184_v7, %s2530_s3 }
0x1521   :  { %v1187_v9 = vpop.permute.xlu1 %1186 }
0x1522   :  { %v1189_v11 = vadd.f32 %v1187_v9, %v1179_v8 }
0x1524   :  { %2425 = vtanh.f32 %v1189_v11 }
0x1525   :  { %2427 = vtanh.f32 %v955_v54 }
0x1526   :  { %2429 = vtanh.f32 %v956_v14 }
0x152e   :  { %v2426_v10 = vpop.eup %2425 }
0x152f   :  { %1192 = vrot.lane.b32.xlu0 %v2426_v10, %s2529_s28  ;;  %v2428_v13 = vpop.eup %2427  ;;  %v1080_v10 = vadd.f32 %v2776_v29, %v2819_v56 }
0x1530   :  { %v2430_v57 = vpop.eup %2429 }
0x1531   :  { %v958_v15 = vadd.f32 1.0, %v2430_v57 }
0x1533   :  { %963 = vrot.lane.b32.xlu0 %v2428_v13, %s2529_s28  ;;  %v959_v18 = vmul.f32 0.5, %v958_v15 }
0x1535   :  { %v961_v23 = vmul.f32 %v959_v18, %v2786_v41 }
0x15a1   :  { %v1193_v16 = vpop.permute.xlu0 %1192 }
0x15a2   :  { %v1195_v17 = vmul.f32 %v1193_v16, %v1177_v5 }
0x15a4   :  { %1197 = vrot.lane.b32.xlu1 %v1195_v17, %s2530_s3 }
0x15a5   :  { %v964_v19 = vpop.permute.xlu0 %963 }
0x15a6   :  { %v966_v21 = vmul.f32 %v964_v19, %v959_v18 }
0x15a8   :  { %968 = vrot.lane.b32.xlu0 %v966_v21, %s2530_s3 }
0x1616   :  { %v2828_v22 = vpop.permute.xlu1 %1197 }
0x1617   :  { %2197 = vmatmul.mubr.msk.f32.vlgmr.msra.gmra.mrb[12].mxu1 %vm195_vm3, %v2828_v22 }
0x1618   :  { %2341 = vmatpush3.bf16.msra.mxu1 %v2790_v45  ;;  %2218 = vmatprep.mubr.msk.f32.mxu1 %vm2527_vm0, %v2528_v1 }
0x1619   :  { %2342 = vmatprep.subr.bf16.mxu1 %v2526_v0 }
0x161a   :  { %v969_v24 = vpop.permute.xlu0 %968 }
0x161b   :  { %v971_v31 = vadd.f32 %v969_v24, %v961_v23 }
0x161c   :  { %2344 = vmatpush3.bf16.msra.mxu1 %v2794_v48 }
0x161d   :  { %2431 = vtanh.f32 %v971_v31  ;;  %2351 = vmatprep.subr.bf16.mxu1 %v2526_v0 }
0x1627   :  { %v2432_v25 = vpop.eup %2431 }
0x1628   :  { %974 = vrot.lane.b32.xlu0 %v2432_v25, %s2529_s28 }
0x169a   :  { %v975_v26 = vpop.permute.xlu0 %974 }
0x169b   :  { %v977_v27 = vmul.f32 %v975_v26, %v959_v18 }
0x169d   :  { %994 = vrot.lane.b32.xlu0 %v977_v27, %s2530_s3 }
0x16ea   :  { %v1267_v20 = vpop.f32.mrb[12].mxu1 }
0x16eb   :  { %v1271_v34 = vadd.f32 %v1267_v20, %v1070_v61  ;;  %v2198_v60 = vpop.f32.mrb[13].mxu1  ;;  %v1085_v20 = vadd.f32 %v2819_v56, %v2783_v33 }
0x16ed   :  { %2433 = vtanh.f32 %v1271_v34  ;;  %v1272_v37 = vmul.f32 0.5, %v1271_v34 }
0x16ef   :  { %2435 = vtanh.f32 %v1272_v37 }
0x16f7   :  { %v2434_v35 = vpop.eup %2433 }
0x16f8   :  { %1279 = vrot.lane.b32.xlu1 %v2434_v35, %s2529_s28 }
0x16f9   :  { %v2436_v38 = vpop.eup %2435 }
0x16fa   :  { %v1274_v39 = vadd.f32 1.0, %v2436_v38 }
0x16fc   :  { %v1275_v40 = vmul.f32 0.5, %v1274_v39 }
0x16fe   :  { %v1277_v42 = vmul.f32 %v1275_v40, %v1189_v11 }
0x170f   :  { %v995_v36 = vpop.permute.xlu0 %994 }
0x1710   :  { %2175 = vmatmul.mubr.msk.f32.gmra.mrb[20].mxu0 %vm195_vm3, %v995_v36 }
0x1711   :  { %2207 = vmatprep.mubr.msk.f32.mxu0 %vm2527_vm0, %v2528_v1 }
0x176a   :  { %v1280_v41 = vpop.permute.xlu1 %1279 }
0x176b   :  { %v1282_v28 = vmul.f32 %v1280_v41, %v1275_v40 }
0x176d   :  { %1284 = vrot.lane.b32.xlu1 %v1282_v28, %s2530_s3 }
0x17df   :  { %v1285_v43 = vpop.permute.xlu1 %1284 }
0x17e0   :  { %v1287_v44 = vadd.f32 %v1285_v43, %v1277_v42 }
0x17e2   :  { %2437 = vtanh.f32 %v1287_v44 }
0x17e3   :  { %v2848_v46 = vpop.f32.mrb[20].mxu0 }
0x17e4   :  { %v2850_v47 = vpop.f32.mrb[21].mxu0 }
0x17ec   :  { %v2438_v49 = vpop.eup %2437 }
0x17ed   :  { %1290 = vrot.lane.b32.xlu1 %v2438_v49, %s2529_s28 }
0x185f   :  { %v1291_v50 = vpop.permute.xlu1 %1290 }
0x1860   :  { %v2853_v51 = vmul.f32 %v1291_v50, %v1275_v40 }
0x1862   :  { %1295 = vrot.lane.b32.xlu1 %v2853_v51, %s2530_s3 }
0x18d4   :  { %v1296_v52 = vpop.permute.xlu1 %1295 }
0x18d5   :  { %2208 = vmatmul.mubr.msk.f32.vlgmr.msra.gmra.mrb[22].mxu0 %vm195_vm3, %v1296_v52 }
0x18d6   :  { %2347 = vmatpush3.bf16.msra.mxu0 %v2790_v45  ;;  %2229 = vmatprep.mubr.msk.f32.mxu0 %vm2527_vm0, %v2528_v1 }
0x18d7   :  { %2348 = vmatprep.subr.bf16.mxu0 %v2526_v0 }
0x18da   :  { %2350 = vmatpush3.bf16.msra.mxu0 %v2794_v48 }
0x18db   :  { %2357 = vmatprep.subr.bf16.mxu0 %v2526_v0 }
0x19a8   :  { %v1365_v54 = vpop.f32.mrb[22].mxu0 }
0x19a9   :  { %v1369_v55 = vadd.f32 %v1365_v54, %v1075_v53  ;;  %v2209_v58 = vpop.f32.mrb[23].mxu0  ;;  %v1090_v53 = vadd.f32 %v2781_v32, %v2819_v56 }
0x19ab   :  { %2439 = vtanh.f32 %v1369_v55  ;;  %v1370_v63 = vmul.f32 0.5, %v1369_v55 }
0x19ad   :  { %2441 = vtanh.f32 %v1370_v63 }
0x19b5   :  { %v2440_v62 = vpop.eup %2439 }
0x19b6   :  { %1377 = vrot.lane.b32.xlu0 %v2440_v62, %s2529_s28 }
0x19b7   :  { %v2442_v2 = vpop.eup %2441 }
0x19b8   :  { %v1372_v3 = vadd.f32 1.0, %v2442_v2 }
0x19ba   :  { %v1373_v4 = vmul.f32 0.5, %v1372_v3 }
0x19bc   :  { %v1375_v5 = vmul.f32 %v1373_v4, %v1287_v44 }
0x1a28   :  { %v1378_v12 = vpop.permute.xlu0 %1377 }
0x1a29   :  { %v1380_v59 = vmul.f32 %v1378_v12, %v1373_v4 }
0x1a2b   :  { %1382 = vrot.lane.b32.xlu1 %v1380_v59, %s2530_s3 }
0x1a9d   :  { %v1383_v6 = vpop.permute.xlu1 %1382 }
0x1a9e   :  { %v1385_v7 = vadd.f32 %v1383_v6, %v1375_v5 }
0x1aa0   :  { %2443 = vtanh.f32 %v1385_v7 }
0x1aaa   :  { %v2444_v30 = vpop.eup %2443 }
0x1aab   :  { %1388 = vrot.lane.b32.xlu0 %v2444_v30, %s2529_s28 }
0x1b1d   :  { %v1389_v8 = vpop.permute.xlu0 %1388 }
0x1b1e   :  { %v2869_v9 = vmul.f32 %v1389_v8, %v1373_v4 }
0x1b20   :  { %1393 = vrot.lane.b32.xlu1 %v2869_v9, %s2530_s3 }
0x1b92   :  { %v1394_v11 = vpop.permute.xlu1 %1393 }
0x1b93   :  { %2219 = vmatmul.mubr.msk.f32.vlgmr.msra.gmra.mrb[14].mxu1 %vm195_vm3, %v1394_v11 }
0x1b94   :  { %2353 = vmatpush3.bf16.msra.mxu1 %v2790_v45  ;;  %2240 = vmatprep.mubr.msk.f32.mxu1 %vm2527_vm0, %v2528_v1 }
0x1b95   :  { %2354 = vmatprep.subr.bf16.mxu1 %v2526_v0 }
0x1b98   :  { %2356 = vmatpush3.bf16.msra.mxu1 %v2794_v48 }
0x1b99   :  { %2363 = vmatprep.subr.bf16.mxu1 %v2526_v0 }
0x1c66   :  { %v1463_v13 = vpop.f32.mrb[14].mxu1 }
0x1c67   :  { %v1467_v14 = vadd.f32 %v1463_v13, %v1080_v10  ;;  %v2220_v57 = vpop.f32.mrb[15].mxu1 }
0x1c69   :  { %2445 = vtanh.f32 %v1467_v14  ;;  %v1468_v16 = vmul.f32 0.5, %v1467_v14 }
0x1c6b   :  { %2447 = vtanh.f32 %v1468_v16 }
0x1c73   :  { %v2446_v15 = vpop.eup %2445 }
0x1c74   :  { %1475 = vrot.lane.b32.xlu0 %v2446_v15, %s2529_s28 }
0x1c75   :  { %v2448_v17 = vpop.eup %2447 }
0x1c76   :  { %v1470_v18 = vadd.f32 1.0, %v2448_v17 }
0x1c78   :  { %v1471_v19 = vmul.f32 0.5, %v1470_v18 }
0x1c7a   :  { %v1473_v24 = vmul.f32 %v1471_v19, %v1385_v7  ;;  %v1095_v7 = vadd.f32 %v2819_v56, %v2850_v47 }
0x1ce6   :  { %v1476_v21 = vpop.permute.xlu0 %1475 }
0x1ce7   :  { %v1478_v23 = vmul.f32 %v1476_v21, %v1471_v19 }
0x1ce9   :  { %1480 = vrot.lane.b32.xlu1 %v1478_v23, %s2530_s3 }
0x1d5b   :  { %v1481_v31 = vpop.permute.xlu1 %1480 }
0x1d5c   :  { %v1483_v25 = vadd.f32 %v1481_v31, %v1473_v24 }
0x1d5e   :  { %2449 = vtanh.f32 %v1483_v25 }
0x1d68   :  { %v2450_v29 = vpop.eup %2449 }
0x1d69   :  { %1486 = vrot.lane.b32.xlu0 %v2450_v29, %s2529_s28 }
0x1ddb   :  { %v1487_v26 = vpop.permute.xlu0 %1486 }
0x1ddc   :  { %v2885_v27 = vmul.f32 %v1487_v26, %v1471_v19 }
0x1dde   :  { %1491 = vrot.lane.b32.xlu1 %v2885_v27, %s2530_s3 }
0x1e50   :  { %v1492_v61 = vpop.permute.xlu1 %1491 }
0x1e51   :  { %2230 = vmatmul.mubr.msk.f32.vlgmr.msra.gmra.mrb[24].mxu0 %vm195_vm3, %v1492_v61 }
0x1e52   :  { %2359 = vmatpush3.bf16.msra.mxu0 %v2790_v45  ;;  %2251 = vmatprep.mubr.msk.f32.mxu0 %vm2527_vm0, %v2528_v1 }
0x1e53   :  { %2360 = vmatprep.subr.bf16.mxu0 %v2526_v0 }
0x1e56   :  { %2362 = vmatpush3.bf16.msra.mxu0 %v2794_v48 }
0x1f24   :  { %v1561_v34 = vpop.f32.mrb[24].mxu0 }
0x1f25   :  { %v1565_v60 = vadd.f32 %v1561_v34, %v1085_v20  ;;  %v2231_v35 = vpop.f32.mrb[25].mxu0 }
0x1f27   :  { %2451 = vtanh.f32 %v1565_v60  ;;  %v1566_v37 = vmul.f32 0.5, %v1565_v60 }
0x1f29   :  { %2453 = vtanh.f32 %v1566_v37 }
0x1f31   :  { %v2452_v36 = vpop.eup %2451 }
0x1f32   :  { %1573 = vrot.lane.b32.xlu0 %v2452_v36, %s2529_s28 }
0x1f33   :  { %v2454_v38 = vpop.eup %2453 }
0x1f34   :  { %v1568_v39 = vadd.f32 1.0, %v2454_v38 }
0x1f36   :  { %v1569_v40 = vmul.f32 0.5, %v1568_v39 }
0x1f38   :  { %v1571_v42 = vmul.f32 %v1569_v40, %v1483_v25  ;;  %v1100_v25 = vadd.f32 %v2848_v46, %v2819_v56 }
0x1fa4   :  { %v1574_v41 = vpop.permute.xlu0 %1573 }
0x1fa5   :  { %v1576_v28 = vmul.f32 %v1574_v41, %v1569_v40 }
0x1fa7   :  { %1578 = vrot.lane.b32.xlu1 %v1576_v28, %s2530_s3 }
0x2019   :  { %v1579_v43 = vpop.permute.xlu1 %1578 }
0x201a   :  { %v1581_v44 = vadd.f32 %v1579_v43, %v1571_v42 }
0x201c   :  { %2455 = vtanh.f32 %v1581_v44 }
0x2026   :  { %v2456_v33 = vpop.eup %2455 }
0x2027   :  { %1584 = vrot.lane.b32.xlu0 %v2456_v33, %s2529_s28 }
0x2099   :  { %v1585_v49 = vpop.permute.xlu0 %1584 }
0x209a   :  { %v1587_v50 = vmul.f32 %v1585_v49, %v1569_v40 }
0x209c   :  { %1589 = vrot.lane.b32.xlu1 %v1587_v50, %s2530_s3 }
0x210e   :  { %v2901_v52 = vpop.permute.xlu1 %1589 }
0x210f   :  { %2241 = vmatmul.mubr.msk.f32.vlgmr.msra.gmra.mrb[16].mxu1 %vm195_vm3, %v2901_v52 }
0x2110   :  { %2365 = vmatpush3.bf16.msra.mxu1 %v2790_v45  ;;  %2262 = vmatprep.mubr.msk.f32.mxu1 %vm2527_vm0, %v2528_v1 }
0x2111   :  { %2366 = vmatprep.subr.bf16.mxu1 %v2526_v0 }
0x2114   :  { %2368 = vmatpush3.bf16.msra.mxu1 %v2794_v48 }
0x21e2   :  { %v1659_v54 = vpop.f32.mrb[16].mxu1 }
0x21e3   :  { %v1663_v55 = vadd.f32 %v1659_v54, %v1090_v53  ;;  %v2242_v58 = vpop.f32.mrb[17].mxu1 }
0x21e5   :  { %2457 = vtanh.f32 %v1663_v55  ;;  %v1664_v63 = vmul.f32 0.5, %v1663_v55 }
0x21e7   :  { %2459 = vtanh.f32 %v1664_v63 }
0x21ef   :  { %v2458_v62 = vpop.eup %2457 }
0x21f0   :  { %1671 = vrot.lane.b32.xlu0 %v2458_v62, %s2529_s28 }
0x21f1   :  { %v2460_v45 = vpop.eup %2459 }
0x21f2   :  { %v1666_v2 = vadd.f32 1.0, %v2460_v45 }
0x21f4   :  { %v1667_v3 = vmul.f32 0.5, %v1666_v2 }
0x21f6   :  { %v1669_v0 = vmul.f32 %v1667_v3, %v1581_v44 }
0x2262   :  { %v1672_v1 = vpop.permute.xlu0 %1671 }
0x2263   :  { %v1674_v4 = vmul.f32 %v1672_v1, %v1667_v3 }
0x2265   :  { %1676 = vrot.lane.b32.xlu1 %v1674_v4, %s2530_s3 }
0x22d7   :  { %v1677_v48 = vpop.permute.xlu1 %1676 }
0x22d8   :  { %v1679_v12 = vadd.f32 %v1677_v48, %v1669_v0 }
0x22da   :  { %2461 = vtanh.f32 %v1679_v12 }
0x22e4   :  { %v2462_v32 = vpop.eup %2461 }
0x22e5   :  { %1682 = vrot.lane.b32.xlu0 %v2462_v32, %s2529_s28 }
0x2357   :  { %v1683_v59 = vpop.permute.xlu0 %1682 }
0x2358   :  { %v1685_v5 = vmul.f32 %v1683_v59, %v1667_v3 }
0x235a   :  { %1687 = vrot.lane.b32.xlu1 %v1685_v5, %s2530_s3 }
0x23cc   :  { %v1688_v6 = vpop.permute.xlu1 %1687 }
0x23cd   :  { %2252 = vmatmul.mubr.msk.f32.vlgmr.msra.gmra.mrb[26].mxu0 %vm195_vm3, %v1688_v6 }
0x24a0   :  { %v1757_v30 = vpop.f32.mrb[26].mxu0 }
0x24a1   :  { %v1761_v8 = vadd.f32 %v1757_v30, %v1095_v7  ;;  %v2253_v11 = vpop.f32.mrb[27].mxu0 }
0x24a3   :  { %2463 = vtanh.f32 %v1761_v8  ;;  %v1762_v13 = vmul.f32 0.5, %v1761_v8 }
0x24a5   :  { %2465 = vtanh.f32 %v1762_v13 }
0x24ad   :  { %v2464_v10 = vpop.eup %2463 }
0x24ae   :  { %1769 = vrot.lane.b32.xlu0 %v2464_v10, %s2529_s28 }
0x24af   :  { %v2466_v14 = vpop.eup %2465 }
0x24b0   :  { %v1764_v57 = vadd.f32 1.0, %v2466_v14 }
0x24b2   :  { %v1765_v15 = vmul.f32 0.5, %v1764_v57 }
0x24b4   :  { %v1767_v18 = vmul.f32 %v1765_v15, %v1679_v12 }
0x2520   :  { %v1770_v16 = vpop.permute.xlu0 %1769 }
0x2521   :  { %v1772_v17 = vmul.f32 %v1770_v16, %v1765_v15 }
0x2523   :  { %1774 = vrot.lane.b32.xlu1 %v1772_v17, %s2530_s3 }
0x2595   :  { %v1775_v19 = vpop.permute.xlu1 %1774 }
0x2596   :  { %v1777_v21 = vadd.f32 %v1775_v19, %v1767_v18 }
0x2598   :  { %2467 = vtanh.f32 %v1777_v21 }
0x25a2   :  { %v2468_v47 = vpop.eup %2467 }
0x25a3   :  { %1780 = vrot.lane.b32.xlu0 %v2468_v47, %s2529_s28 }
0x2615   :  { %v1781_v23 = vpop.permute.xlu0 %1780 }
0x2616   :  { %v1783_v24 = vmul.f32 %v1781_v23, %v1765_v15 }
0x2618   :  { %1785 = vrot.lane.b32.xlu1 %v1783_v24, %s2530_s3 }
0x268a   :  { %v1786_v31 = vpop.permute.xlu1 %1785 }
0x268b   :  { %2263 = vmatmul.mubr.msk.f32.vlgmr.msra.gmra.mrb[18].mxu1 %vm195_vm3, %v1786_v31 }
0x275e   :  { %v1855_v29 = vpop.f32.mrb[18].mxu1 }
0x275f   :  { %v1859_v26 = vadd.f32 %v1855_v29, %v1100_v25  ;;  %v2264_v61 = vpop.f32.mrb[19].mxu1 }
0x2761   :  { %2469 = vtanh.f32 %v1859_v26  ;;  %v1860_v34 = vmul.f32 0.5, %v1859_v26 }
0x2763   :  { %2471 = vtanh.f32 %v1860_v34 }
0x276b   :  { %v2470_v20 = vpop.eup %2469 }
0x276c   :  { %1867 = vrot.lane.b32.xlu0 %v2470_v20, %s2529_s28 }
0x276d   :  { %v2472_v60 = vpop.eup %2471 }
0x276e   :  { %v1862_v35 = vadd.f32 1.0, %v2472_v60 }
0x2770   :  { %1890 = vrot.lane.b32.xlu0 %v1685_v5, %s2529_s28  ;;  %v1863_v36 = vmul.f32 0.5, %v1862_v35 }
0x2772   :  { %v1865_v56 = vmul.f32 %v1863_v36, %v1777_v21 }
0x27de   :  { %v1868_v37 = vpop.permute.xlu0 %1867 }
0x27df   :  { %v1870_v38 = vmul.f32 %v1868_v37, %v1863_v36 }
0x27e1   :  { %1872 = vrot.lane.b32.xlu1 %v1870_v38, %s2530_s3 }
0x27e5   :  { %1883 = vrot.lane.b32.xlu1 %v2853_v51, %s2529_s28 }
0x27e9   :  { %1886 = vrot.lane.b32.xlu1 %v2869_v9, %s2531_s6  ;;  %v1891_v9 = vpop.permute.xlu0 %1890 }
0x27ea   :  { %v1901_v33 = vsel %vm195_vm3, %v2901_v52, %v1891_v9 }
0x2853   :  { %v1873_v46 = vpop.permute.xlu1 %1872 }
0x2854   :  { %v1875_v39 = vadd.f32 %v1873_v46, %v1865_v56 }
0x2856   :  { %2473 = vtanh.f32 %v1875_v39 }
0x2857   :  { %v1884_v40 = vpop.permute.xlu1 %1883 }
0x2858   :  { %v1896_v41 = vsel %vm195_vm3, %v2828_v22, %v1884_v40 }
0x285b   :  { %v1887_v28 = vpop.permute.xlu1 %1886 }
0x285c   :  { %v1898_v42 = vsel %vm1897_vm4, %v1896_v41, %v1887_v28 }
0x285d   :  { %v1900_v43 = vsel %vm1899_vm5, %v1898_v42, %v2885_v27 }
0x285e   :  { %1904 = vst [vmem:[#allocation5] sm:$0xff] %v1900_v43 }
0x2860   :  { %v2474_v51 = vpop.eup %2473 }
0x2861   :  { %1878 = vrot.lane.b32.xlu0 %v2474_v51, %s2529_s28 }
0x2865   :  { %1893 = vrot.lane.b32.xlu0 %v1783_v24, %s2531_s6 }
0x28d3   :  { %v1879_v44 = vpop.permute.xlu0 %1878 }
0x28d4   :  { %v1881_v49 = vmul.f32 %v1879_v44, %v1863_v36 }
0x28d7   :  { %v1894_v22 = vpop.permute.xlu0 %1893 }
0x28d8   :  { %v1902_v50 = vsel %vm1897_vm4, %v1901_v33, %v1894_v22 }
0x28d9   :  { %v1903_v53 = vsel %vm1899_vm5, %v1902_v50, %v1881_v49 }
0x28da   :  { %1905 = vst [vmem:[#allocation5 + $0x8] sm:$0xff] %v1903_v53 }
0x28db   :  { %2508 = shalt.err (!%p2505_p12)
}
0x28dc   :  { %s2509_s28 = scalar_lea.hbm %s2961_s7, 256 }
0x28dd   :  { %p2510_p13 = scmp.ne.s32.totalorder %s2961_s7, %s2509_s28  ;;  %p2513_p0 = scmp.lt.u32.totalorder %s2509_s28, %s2961_s7 }
0x28df   :  { %p2515_p1 = pnand %p2513_p0, %p2510_p13 }
0x28e1   :  { %2518 = shalt.err (!%p2515_p1)
}
0x28e2   :  { %1915 = dma.vmem_to_hbm [thread:$0]  %s1913_s26, 256, %s2961_s7, [#allocation4]  }
0x28e3   :  { %2521 = dma.done.wait [#allocation4], 256  }
0x28e4   :  { %2522 = vsyncadd [#allocation4], 4294967040 }
0x28e5   :  { %1919 = vsyncpa [#allocation3], 1 }
0x28e6   :  { %1920 = vsyncpa [#allocation4], 1 }

</bundles_post_ra>
